<compile_context>
chip_gen: v7x
topology: tpu7x:2x2x1
jax: 0.10.0
libtpu: 0.0.40
codegen_flags: <defaults>
</compile_context>

<pallas_src>
import functools

import jax
import jax.numpy as jnp
from jax.experimental import pallas as pl
from jax.experimental.pallas import tpu as pltpu

_EPS = 1e-5


def _round_up(a, b):
    return (a + b - 1) // b * b


def _vmem_budget_bytes():
    cap = 64 * 1024 * 1024
    try:
        info = pltpu.get_tpu_info()
        cap = int(getattr(info, "vmem_capacity_bytes", cap))
    except Exception:
        pass
    cap = max(cap, 32 * 1024 * 1024)
    return (cap * 3) // 4


# ----------------------------------------------------------------------------
# Fused path (kernel_size == 2): LayerNorm + pad-mask + stride-2 conv in one kernel
# ----------------------------------------------------------------------------
def _down2_fused_kernel(x_ref, w_ref, g_ref, b_ref, bias_ref, o_ref, *,
                        cin, h_in, w_in, eps, cdtype, mask_rows, mask_cols):
    # x_ref:    (1, 2*tho, Wo, 2*cin)  raw (zero-padded) input, column phases packed in lanes
    # w_ref:    (4*cin, tn)            conv weight, tap-major (di*2+dj), compute dtype
    # g_ref:    (1, cin)  / b_ref: (1, cin)   LayerNorm gamma / beta (f32)
    # bias_ref: (1, tn)                conv bias (f32)
    # o_ref:    (1, tho, Wo, tn)
    _, tho, wo, tn = o_ref.shape
    x = x_ref[0].reshape(tho, 2, wo, 2 * cin)   # split row phases (leading dims only: free)
    gamma = g_ref[0]
    beta = b_ref[0]
    inv_cin = 1.0 / cin

    need_mask = mask_rows or mask_cols
    if need_mask:
        r0 = pl.program_id(1) * tho             # first output row handled by this tile
        oh = jax.lax.broadcasted_iota(jnp.int32, (tho, wo), 0) + r0
        ow = jax.lax.broadcasted_iota(jnp.int32, (tho, wo), 1)

    taps = []
    for di in range(2):
        xr = x[:, di]                           # (tho, wo, 2*cin)
        for dj in range(2):
            tap = xr[:, :, dj * cin:(dj + 1) * cin].astype(jnp.float32)
            # LayerNorm over channels (f32, E[x^2]-mu^2 form); zero padded positions so
            # the result matches the reference "pad with zeros AFTER the norm".
            mu = jnp.sum(tap, axis=-1, keepdims=True) * inv_cin
            var = jnp.sum(tap * tap, axis=-1, keepdims=True) * inv_cin - mu * mu
            t = (tap - mu) * jax.lax.rsqrt(var + eps) * gamma + beta
            if need_mask:
                ok = None
                if mask_rows:
                    ok = (2 * oh + di) < h_in
                if mask_cols:
                    cmask = (2 * ow + dj) < w_in
                    ok = cmask if ok is None else (ok & cmask)
                t = jnp.where(ok[:, :, None], t, 0.0)
            taps.append(t)

    # One K = 4*cin contraction (fills the MXU, single accumulator pass).
    lhs = jnp.concatenate(taps, axis=-1).reshape(tho * wo, 4 * cin).astype(cdtype)
    acc = jnp.dot(lhs, w_ref[...], preferred_element_type=jnp.float32)
    acc = acc + bias_ref[0].astype(jnp.float32)
    o_ref[0] = acc.reshape(tho, wo, tn).astype(o_ref.dtype)


def _pick_k2_tiles(batch, ho, wo, cin, cout, in_bytes, out_bytes, c_bytes, budget):
    # Cout tile: prefer the full (lane-dense) Cout so input/LN is never redone.
    tn = cout
    if 2 * (4 * cin * cout * c_bytes) > budget // 4:
        for cand in (512, 384, 256, 128):
            if cout % cand == 0:
                tn = cand
                break

    def step_bytes(tho):
        rows = tho * wo
        x_blk = 2 * tho * wo * 2 * cin * in_bytes
        w_blk = 4 * cin * tn * c_bytes
        o_blk = rows * tn * out_bytes
        interm = rows * cin * 4 * 6 + rows * 4 * cin * c_bytes + rows * tn * 8
        return 2 * (x_blk + w_blk + o_blk) + interm

    divisors = [d for d in range(1, ho + 1) if ho % d == 0]
    tho = 1
    for d in divisors:
        if d * wo <= 4096 and step_bytes(d) <= budget:
            tho = max(tho, d)
    # Keep a few parallel grid steps so megacore / multi-TC chips stay busy.
    if batch * (ho // tho) < 4:
        for d in sorted(divisors, reverse=True):
            if d < tho and d * wo >= 256 and batch * (ho // d) >= 4:
                tho = d
                break
    return tho, tn


def _downsample_k2(x_nhwc, p, *, compute_dtype):
    B, H, W, cin = x_nhwc.shape
    w = p["conv_w"]                              # (Cout, Cin, 2, 2) torch OIHW layout
    cout = w.shape[0]
    ho, wo = (H + 1) // 2, (W + 1) // 2
    hp, wp = 2 * ho, 2 * wo
    mask_rows = hp != H
    mask_cols = wp != W
    if mask_rows or mask_cols:                   # only odd H/W pays the wrapper pad copy
        x_nhwc = jnp.pad(x_nhwc, ((0, 0), (0, hp - H), (0, wp - W), (0, 0)))
    xp = x_nhwc.reshape(B, hp, wo, 2 * cin)      # pack column phases into lanes (free)

    budget = _vmem_budget_bytes()
    c_bytes = jnp.dtype(compute_dtype).itemsize
    tho, tn = _pick_k2_tiles(B, ho, wo, cin, cout,
                             jnp.dtype(xp.dtype).itemsize,
                             jnp.dtype(x_nhwc.dtype).itemsize, c_bytes, budget)

    wr = jnp.transpose(w, (2, 3, 1, 0)).reshape(4 * cin, cout).astype(compute_dtype)
    # Cout axis innermost: weights change fastest, the (larger) input block is cached.
    grid = (B, ho // tho, cout // tn)

    kernel = functools.partial(_down2_fused_kernel, cin=cin, h_in=H, w_in=W,
                               eps=_EPS, cdtype=compute_dtype,
                               mask_rows=mask_rows, mask_cols=mask_cols)
    out = pl.pallas_call(
        kernel,
        out_shape=jax.ShapeDtypeStruct((B, ho, wo, cout), x_nhwc.dtype),
        grid=grid,
        in_specs=[
            pl.BlockSpec((1, 2 * tho, wo, 2 * cin), lambda b, r, n: (b, r, 0, 0)),
            pl.BlockSpec((4 * cin, tn), lambda b, r, n: (0, n)),
            pl.BlockSpec((1, cin), lambda b, r, n: (0, 0)),
            pl.BlockSpec((1, cin), lambda b, r, n: (0, 0)),
            pl.BlockSpec((1, tn), lambda b, r, n: (0, n)),
        ],
        out_specs=pl.BlockSpec((1, tho, wo, tn), lambda b, r, n: (b, r, 0, n)),
        compiler_params=pltpu.CompilerParams(
            dimension_semantics=("parallel", "parallel", "parallel"),
            vmem_limit_bytes=budget),
    )(xp, wr, p["norm_g"].reshape(1, cin), p["norm_b"].reshape(1, cin),
      p["conv_b"].reshape(1, cout))
    return out


# ----------------------------------------------------------------------------
# General path (kernel_size != 2): tiled LayerNorm + im2col + tiled matmul
# ----------------------------------------------------------------------------
def _layernorm_kernel(x_ref, g_ref, b_ref, o_ref, *, eps, inv_c):
    x = x_ref[...].astype(jnp.float32)
    mu = jnp.sum(x, axis=-1, keepdims=True) * inv_c
    var = jnp.sum(x * x, axis=-1, keepdims=True) * inv_c - mu * mu
    y = (x - mu) * jax.lax.rsqrt(var + eps)
    o_ref[...] = (y * g_ref[...] + b_ref[...]).astype(o_ref.dtype)


def _layernorm(x2d, gamma, beta, out_dtype, budget, *, block_rows=2048):
    m, c = x2d.shape
    tm = min(block_rows, max(8, (budget // (c * 4 * 6)) // 8 * 8))
    tm = min(tm, _round_up(m, 8))
    mp = _round_up(m, tm)
    if mp > m:
        x2d = jnp.pad(x2d, ((0, mp - m), (0, 0)))
    out = pl.pallas_call(
        functools.partial(_layernorm_kernel, eps=_EPS, inv_c=1.0 / c),
        out_shape=jax.ShapeDtypeStruct((mp, c), out_dtype),
        grid=(mp // tm,),
        in_specs=[pl.BlockSpec((tm, c), lambda i: (i, 0)),
                  pl.BlockSpec((1, c), lambda i: (0, 0)),
                  pl.BlockSpec((1, c), lambda i: (0, 0))],
        out_specs=pl.BlockSpec((tm, c), lambda i: (i, 0)),
        compiler_params=pltpu.CompilerParams(
            dimension_semantics=("parallel",),
            vmem_limit_bytes=budget),
    )(x2d, gamma.reshape(1, c), beta.reshape(1, c))
    return out[:m]


def _matmul_bias_kernel(x_ref, w_ref, b_ref, o_ref, acc_ref):
    @pl.when(pl.program_id(2) == 0)
    def _():
        acc_ref[...] = jnp.zeros_like(acc_ref)

    acc_ref[...] += jnp.dot(x_ref[...], w_ref[...],
                            preferred_element_type=jnp.float32)

    @pl.when(pl.program_id(2) == pl.num_programs(2) - 1)
    def _():
        o_ref[...] = (acc_ref[...] + b_ref[...].astype(jnp.float32)).astype(o_ref.dtype)


def _matmul_bias(x2d, w2d, bias, out_dtype, budget):
    m, k = x2d.shape
    _, n = w2d.shape
    tm = 256 if m >= 256 else _round_up(m, 8)
    tk = 512 if k >= 512 else (256 if k >= 256 else _round_up(k, 8))
    if n % 256 == 0:
        tn = 256
    elif n % 128 == 0:
        tn = 128
    else:
        tn = n
    mp, kp = _round_up(m, tm), _round_up(k, tk)
    if mp > m or kp > k:
        x2d = jnp.pad(x2d, ((0, mp - m), (0, kp - k)))
    if kp > k:
        w2d = jnp.pad(w2d, ((0, kp - k), (0, 0)))
    grid = (mp // tm, n // tn, kp // tk)
    out = pl.pallas_call(
        _matmul_bias_kernel,
        out_shape=jax.ShapeDtypeStruct((mp, n), out_dtype),
        grid=grid,
        in_specs=[pl.BlockSpec((tm, tk), lambda i, j, kk: (i, kk)),
                  pl.BlockSpec((tk, tn), lambda i, j, kk: (kk, j)),
                  pl.BlockSpec((1, tn), lambda i, j, kk: (0, j))],
        out_specs=pl.BlockSpec((tm, tn), lambda i, j, kk: (i, j)),
        scratch_shapes=[pltpu.VMEM((tm, tn), jnp.float32)],
        compiler_params=pltpu.CompilerParams(
            dimension_semantics=("parallel", "parallel", "arbitrary"),
            vmem_limit_bytes=budget),
    )(x2d, w2d, bias.reshape(1, n))
    return out[:m]


def _downsample_general(x_nhwc, p, kernel_size, *, compute_dtype):
    B, H, W, cin = x_nhwc.shape
    k = kernel_size
    w = p["conv_w"]
    cout = w.shape[0]
    budget = _vmem_budget_bytes()

    xn = _layernorm(x_nhwc.reshape(B * H * W, cin), p["norm_g"], p["norm_b"],
                    compute_dtype, budget)
    xn = xn.reshape(B, H, W, cin)

    if k % 2 == 0:
        pad_b = (k - H % k) % k
        pad_r = (k - W % k) % k
        xp = jnp.pad(xn, ((0, 0), (0, pad_b), (0, pad_r), (0, 0)))
    else:
        pd = k // 2
        xp = jnp.pad(xn, ((0, 0), (pd, pd), (pd, pd), (0, 0)))
    hp, wp = xp.shape[1], xp.shape[2]
    ho = (hp - k) // 2 + 1
    wo = (wp - k) // 2 + 1

    cols = []
    for i in range(k):
        for j in range(k):
            cols.append(xp[:, i:i + 2 * (ho - 1) + 1:2, j:j + 2 * (wo - 1) + 1:2, :])
    pat = jnp.stack(cols, axis=3).reshape(B * ho * wo, k * k * cin)

    wr = jnp.transpose(w, (2, 3, 1, 0)).reshape(k * k * cin, cout).astype(compute_dtype)
    y = _matmul_bias(pat, wr, p["conv_b"], x_nhwc.dtype, budget)
    return y.reshape(B, ho, wo, cout)


# ----------------------------------------------------------------------------
# Public forward (matches the PyTorch Downsample module)
# ----------------------------------------------------------------------------
def downsample(x_nchw, params, kernel_size, *, compute_dtype=jnp.bfloat16):
    x = jnp.transpose(x_nchw, (0, 2, 3, 1))       # NCHW -> NHWC (channels on lanes)
    if kernel_size == 2:
        y = _downsample_k2(x, params, compute_dtype=compute_dtype)
    else:
        y = _downsample_general(x, params, kernel_size, compute_dtype=compute_dtype)
    return jnp.transpose(y, (0, 3, 1, 2))         # NHWC -> NCHW


# ----------------------------------------------------------------------------
# Pure-JAX reference (mirrors the PyTorch module exactly)
# ----------------------------------------------------------------------------
def downsample_ref(x_nchw, params, kernel_size):
    g, b = params["norm_g"], params["norm_b"]
    w, bias = params["conv_w"], params["conv_b"]
    k = kernel_size
    _, _, H, W = x_nchw.shape
    xt = jnp.transpose(x_nchw, (0, 2, 3, 1)).astype(jnp.float32)
    mu = jnp.mean(xt, axis=-1, keepdims=True)
    var = jnp.mean(jnp.square(xt - mu), axis=-1, keepdims=True)
    xn = (xt - mu) * jax.lax.rsqrt(var + _EPS) * g + b
    xn = jnp.transpose(xn, (0, 3, 1, 2))
    if k % 2 == 0:
        pad_b = (k - H % k) % k
        pad_r = (k - W % k) % k
        xn = jnp.pad(xn, ((0, 0), (0, 0), (0, pad_b), (0, pad_r)))
        pads = [(0, 0), (0, 0)]
    else:
        pads = [(k // 2, k // 2), (k // 2, k // 2)]
    y = jax.lax.conv_general_dilated(xn, w, (2, 2), pads,
                                     dimension_numbers=("NCHW", "OIHW", "NCHW"))
    return y + bias[None, :, None, None]


# ----------------------------------------------------------------------------
if __name__ == "__main__":
    root = jax.random.PRNGKey(0)

    def make_params(key, cin, cout, k):
        k1, k2, k3, k4 = jax.random.split(key, 4)
        return {
            "norm_g": 1.0 + 0.1 * jax.random.normal(k1, (cin,), jnp.float32),
            "norm_b": 0.05 * jax.random.normal(k2, (cin,), jnp.float32),
            "conv_w": 0.05 * jax.random.normal(k3, (cout, cin, k, k), jnp.float32),
            "conv_b": 0.02 * jax.random.normal(k4, (cout,), jnp.float32),
        }

    def run_case(key, b, cin, h, w, cout, k, compute_dtype=jnp.bfloat16, tol=5e-2):
        kp, kx = jax.random.split(key)
        params = make_params(kp, cin, cout, k)
        x = jax.random.normal(kx, (b, cin, h, w), jnp.float32)
        y = jax.block_until_ready(downsample(x, params, k, compute_dtype=compute_dtype))
        ref = downsample_ref(x, params, k)
        assert y.shape == ref.shape, (y.shape, ref.shape)
        assert bool(jnp.all(jnp.isfinite(y)))
        err = float(jnp.max(jnp.abs(y - ref)) / (jnp.max(jnp.abs(ref)) + 1e-6))
        assert err < tol, ("mismatch", k, h, w, err)

    keys = jax.random.split(root, 3)
    run_case(keys[0], 2, 16, 16, 16, 32, 2)   # fused path, even H/W (mask compiled out)
    run_case(keys[1], 2, 16, 15, 15, 32, 2)   # fused path, odd H/W (bottom/right zero pad)
    run_case(keys[2], 2, 16, 16, 16, 32, 3)   # general path: LN + im2col + tiled matmul
    # tighter f32-compute check (no bf16 MXU drift)
    run_case(keys[0], 2, 16, 16, 16, 32, 2, compute_dtype=jnp.float32, tol=2e-3)
    print("KERNEL_OK")
</pallas_src>

<mosaic_0001>
module attributes {stable_mosaic.version = 11 : i64} {
  func.func @_down2_fused_kernel(%arg0: i32, %arg1: i32, %arg2: i32, %arg3: memref<1x16x8x32xf32, #tpu.memory_space<vmem>>, %arg4: memref<64x32xbf16, #tpu.memory_space<vmem>>, %arg5: memref<1x16xf32, #tpu.memory_space<vmem>>, %arg6: memref<1x16xf32, #tpu.memory_space<vmem>>, %arg7: memref<1x32xf32, #tpu.memory_space<vmem>>, %arg8: memref<1x8x8x32xf32, #tpu.memory_space<vmem>>) attributes {dimension_semantics = [#tpu.dimension_semantics<parallel>, #tpu.dimension_semantics<parallel>, #tpu.dimension_semantics<parallel>], iteration_bounds = array<i64: 2, 1, 1>, scalar_prefetch = 0 : i64, scratch_operands = 0 : i64, tpu.core_type = #tpu.core_type<tc>, window_params = [{transform_indices = @transform_0, window_bounds = array<i64: 1, 16, 8, 32>}, {transform_indices = @transform_1, window_bounds = array<i64: 64, 32>}, {pipeline_mode = #tpu.pipeline_mode<synchronous>, transform_indices = @transform_2, window_bounds = array<i64: 1, 16>}, {pipeline_mode = #tpu.pipeline_mode<synchronous>, transform_indices = @transform_3, window_bounds = array<i64: 1, 16>}, {transform_indices = @transform_4, window_bounds = array<i64: 1, 32>}, {transform_indices = @transform_5, window_bounds = array<i64: 1, 8, 8, 32>}]} {
    %c0 = arith.constant 0 : index
    %c0_0 = arith.constant 0 : index
    %c0_1 = arith.constant 0 : index
    %c0_2 = arith.constant 0 : index
    %0 = vector.load %arg3[%c0, %c0_0, %c0_1, %c0_2] : memref<1x16x8x32xf32, #tpu.memory_space<vmem>>, vector<1x16x8x32xf32>
    %1 = vector.shape_cast %0 : vector<1x16x8x32xf32> to vector<16x8x32xf32>
    %2 = vector.shape_cast %1 : vector<16x8x32xf32> to vector<8x2x8x32xf32>
    %c0_3 = arith.constant 0 : index
    %c0_4 = arith.constant 0 : index
    %3 = vector.load %arg5[%c0_3, %c0_4] : memref<1x16xf32, #tpu.memory_space<vmem>>, vector<1x16xf32>
    %4 = vector.shape_cast %3 : vector<1x16xf32> to vector<16xf32>
    %c0_5 = arith.constant 0 : index
    %c0_6 = arith.constant 0 : index
    %5 = vector.load %arg6[%c0_5, %c0_6] : memref<1x16xf32, #tpu.memory_space<vmem>>, vector<1x16xf32>
    %6 = vector.shape_cast %5 : vector<1x16xf32> to vector<16xf32>
    %7 = vector.extract_strided_slice %2 {offsets = [0, 0, 0, 0], sizes = [8, 1, 8, 32], strides = [1, 1, 1, 1]} : vector<8x2x8x32xf32> to vector<8x1x8x32xf32>
    %8 = vector.shape_cast %7 : vector<8x1x8x32xf32> to vector<8x8x32xf32>
    %9 = vector.extract_strided_slice %8 {offsets = [0, 0, 0], sizes = [8, 8, 16], strides = [1, 1, 1]} : vector<8x8x32xf32> to vector<8x8x16xf32>
    %cst = arith.constant dense<0.000000e+00> : vector<8x8xf32>
    %10 = vector.multi_reduction <add>, %9, %cst [2] : vector<8x8x16xf32> to vector<8x8xf32>
    %11 = vector.shape_cast %10 : vector<8x8xf32> to vector<8x8x1xf32>
    %cst_7 = arith.constant 6.250000e-02 : f32
    %12 = vector.broadcast %cst_7 : f32 to vector<8x8x1xf32>
    %13 = arith.mulf %11, %12 : vector<8x8x1xf32>
    %14 = arith.mulf %9, %9 : vector<8x8x16xf32>
    %cst_8 = arith.constant dense<0.000000e+00> : vector<8x8xf32>
    %15 = vector.multi_reduction <add>, %14, %cst_8 [2] : vector<8x8x16xf32> to vector<8x8xf32>
    %16 = vector.shape_cast %15 : vector<8x8xf32> to vector<8x8x1xf32>
    %cst_9 = arith.constant 6.250000e-02 : f32
    %17 = vector.broadcast %cst_9 : f32 to vector<8x8x1xf32>
    %18 = arith.mulf %16, %17 : vector<8x8x1xf32>
    %19 = arith.mulf %13, %13 : vector<8x8x1xf32>
    %20 = arith.subf %18, %19 : vector<8x8x1xf32>
    %21 = vector.broadcast %13 : vector<8x8x1xf32> to vector<8x8x16xf32>
    %22 = arith.subf %9, %21 : vector<8x8x16xf32>
    %cst_10 = arith.constant 9.99999974E-6 : f32
    %23 = vector.broadcast %cst_10 : f32 to vector<8x8x1xf32>
    %24 = arith.addf %20, %23 : vector<8x8x1xf32>
    %25 = math.rsqrt %24 : vector<8x8x1xf32>
    %26 = vector.broadcast %25 : vector<8x8x1xf32> to vector<8x8x16xf32>
    %27 = arith.mulf %22, %26 : vector<8x8x16xf32>
    %28 = vector.shape_cast %4 : vector<16xf32> to vector<1x1x16xf32>
    %29 = vector.broadcast %28 : vector<1x1x16xf32> to vector<8x8x16xf32>
    %30 = arith.mulf %27, %29 : vector<8x8x16xf32>
    %31 = vector.shape_cast %6 : vector<16xf32> to vector<1x1x16xf32>
    %32 = vector.broadcast %31 : vector<1x1x16xf32> to vector<8x8x16xf32>
    %33 = arith.addf %30, %32 : vector<8x8x16xf32>
    %34 = vector.extract_strided_slice %8 {offsets = [0, 0, 16], sizes = [8, 8, 16], strides = [1, 1, 1]} : vector<8x8x32xf32> to vector<8x8x16xf32>
    %cst_11 = arith.constant dense<0.000000e+00> : vector<8x8xf32>
    %35 = vector.multi_reduction <add>, %34, %cst_11 [2] : vector<8x8x16xf32> to vector<8x8xf32>
    %36 = vector.shape_cast %35 : vector<8x8xf32> to vector<8x8x1xf32>
    %cst_12 = arith.constant 6.250000e-02 : f32
    %37 = vector.broadcast %cst_12 : f32 to vector<8x8x1xf32>
    %38 = arith.mulf %36, %37 : vector<8x8x1xf32>
    %39 = arith.mulf %34, %34 : vector<8x8x16xf32>
    %cst_13 = arith.constant dense<0.000000e+00> : vector<8x8xf32>
    %40 = vector.multi_reduction <add>, %39, %cst_13 [2] : vector<8x8x16xf32> to vector<8x8xf32>
    %41 = vector.shape_cast %40 : vector<8x8xf32> to vector<8x8x1xf32>
    %cst_14 = arith.constant 6.250000e-02 : f32
    %42 = vector.broadcast %cst_14 : f32 to vector<8x8x1xf32>
    %43 = arith.mulf %41, %42 : vector<8x8x1xf32>
    %44 = arith.mulf %38, %38 : vector<8x8x1xf32>
    %45 = arith.subf %43, %44 : vector<8x8x1xf32>
    %46 = vector.broadcast %38 : vector<8x8x1xf32> to vector<8x8x16xf32>
    %47 = arith.subf %34, %46 : vector<8x8x16xf32>
    %cst_15 = arith.constant 9.99999974E-6 : f32
    %48 = vector.broadcast %cst_15 : f32 to vector<8x8x1xf32>
    %49 = arith.addf %45, %48 : vector<8x8x1xf32>
    %50 = math.rsqrt %49 : vector<8x8x1xf32>
    %51 = vector.broadcast %50 : vector<8x8x1xf32> to vector<8x8x16xf32>
    %52 = arith.mulf %47, %51 : vector<8x8x16xf32>
    %53 = vector.shape_cast %4 : vector<16xf32> to vector<1x1x16xf32>
    %54 = vector.broadcast %53 : vector<1x1x16xf32> to vector<8x8x16xf32>
    %55 = arith.mulf %52, %54 : vector<8x8x16xf32>
    %56 = vector.shape_cast %6 : vector<16xf32> to vector<1x1x16xf32>
    %57 = vector.broadcast %56 : vector<1x1x16xf32> to vector<8x8x16xf32>
    %58 = arith.addf %55, %57 : vector<8x8x16xf32>
    %59 = vector.extract_strided_slice %2 {offsets = [0, 1, 0, 0], sizes = [8, 1, 8, 32], strides = [1, 1, 1, 1]} : vector<8x2x8x32xf32> to vector<8x1x8x32xf32>
    %60 = vector.shape_cast %59 : vector<8x1x8x32xf32> to vector<8x8x32xf32>
    %61 = vector.extract_strided_slice %60 {offsets = [0, 0, 0], sizes = [8, 8, 16], strides = [1, 1, 1]} : vector<8x8x32xf32> to vector<8x8x16xf32>
    %cst_16 = arith.constant dense<0.000000e+00> : vector<8x8xf32>
    %62 = vector.multi_reduction <add>, %61, %cst_16 [2] : vector<8x8x16xf32> to vector<8x8xf32>
    %63 = vector.shape_cast %62 : vector<8x8xf32> to vector<8x8x1xf32>
    %cst_17 = arith.constant 6.250000e-02 : f32
    %64 = vector.broadcast %cst_17 : f32 to vector<8x8x1xf32>
    %65 = arith.mulf %63, %64 : vector<8x8x1xf32>
    %66 = arith.mulf %61, %61 : vector<8x8x16xf32>
    %cst_18 = arith.constant dense<0.000000e+00> : vector<8x8xf32>
    %67 = vector.multi_reduction <add>, %66, %cst_18 [2] : vector<8x8x16xf32> to vector<8x8xf32>
    %68 = vector.shape_cast %67 : vector<8x8xf32> to vector<8x8x1xf32>
    %cst_19 = arith.constant 6.250000e-02 : f32
    %69 = vector.broadcast %cst_19 : f32 to vector<8x8x1xf32>
    %70 = arith.mulf %68, %69 : vector<8x8x1xf32>
    %71 = arith.mulf %65, %65 : vector<8x8x1xf32>
    %72 = arith.subf %70, %71 : vector<8x8x1xf32>
    %73 = vector.broadcast %65 : vector<8x8x1xf32> to vector<8x8x16xf32>
    %74 = arith.subf %61, %73 : vector<8x8x16xf32>
    %cst_20 = arith.constant 9.99999974E-6 : f32
    %75 = vector.broadcast %cst_20 : f32 to vector<8x8x1xf32>
    %76 = arith.addf %72, %75 : vector<8x8x1xf32>
    %77 = math.rsqrt %76 : vector<8x8x1xf32>
    %78 = vector.broadcast %77 : vector<8x8x1xf32> to vector<8x8x16xf32>
    %79 = arith.mulf %74, %78 : vector<8x8x16xf32>
    %80 = vector.shape_cast %4 : vector<16xf32> to vector<1x1x16xf32>
    %81 = vector.broadcast %80 : vector<1x1x16xf32> to vector<8x8x16xf32>
    %82 = arith.mulf %79, %81 : vector<8x8x16xf32>
    %83 = vector.shape_cast %6 : vector<16xf32> to vector<1x1x16xf32>
    %84 = vector.broadcast %83 : vector<1x1x16xf32> to vector<8x8x16xf32>
    %85 = arith.addf %82, %84 : vector<8x8x16xf32>
    %86 = vector.extract_strided_slice %60 {offsets = [0, 0, 16], sizes = [8, 8, 16], strides = [1, 1, 1]} : vector<8x8x32xf32> to vector<8x8x16xf32>
    %cst_21 = arith.constant dense<0.000000e+00> : vector<8x8xf32>
    %87 = vector.multi_reduction <add>, %86, %cst_21 [2] : vector<8x8x16xf32> to vector<8x8xf32>
    %88 = vector.shape_cast %87 : vector<8x8xf32> to vector<8x8x1xf32>
    %cst_22 = arith.constant 6.250000e-02 : f32
    %89 = vector.broadcast %cst_22 : f32 to vector<8x8x1xf32>
    %90 = arith.mulf %88, %89 : vector<8x8x1xf32>
    %91 = arith.mulf %86, %86 : vector<8x8x16xf32>
    %cst_23 = arith.constant dense<0.000000e+00> : vector<8x8xf32>
    %92 = vector.multi_reduction <add>, %91, %cst_23 [2] : vector<8x8x16xf32> to vector<8x8xf32>
    %93 = vector.shape_cast %92 : vector<8x8xf32> to vector<8x8x1xf32>
    %cst_24 = arith.constant 6.250000e-02 : f32
    %94 = vector.broadcast %cst_24 : f32 to vector<8x8x1xf32>
    %95 = arith.mulf %93, %94 : vector<8x8x1xf32>
    %96 = arith.mulf %90, %90 : vector<8x8x1xf32>
    %97 = arith.subf %95, %96 : vector<8x8x1xf32>
    %98 = vector.broadcast %90 : vector<8x8x1xf32> to vector<8x8x16xf32>
    %99 = arith.subf %86, %98 : vector<8x8x16xf32>
    %cst_25 = arith.constant 9.99999974E-6 : f32
    %100 = vector.broadcast %cst_25 : f32 to vector<8x8x1xf32>
    %101 = arith.addf %97, %100 : vector<8x8x1xf32>
    %102 = math.rsqrt %101 : vector<8x8x1xf32>
    %103 = vector.broadcast %102 : vector<8x8x1xf32> to vector<8x8x16xf32>
    %104 = arith.mulf %99, %103 : vector<8x8x16xf32>
    %105 = vector.shape_cast %4 : vector<16xf32> to vector<1x1x16xf32>
    %106 = vector.broadcast %105 : vector<1x1x16xf32> to vector<8x8x16xf32>
    %107 = arith.mulf %104, %106 : vector<8x8x16xf32>
    %108 = vector.shape_cast %6 : vector<16xf32> to vector<1x1x16xf32>
    %109 = vector.broadcast %108 : vector<1x1x16xf32> to vector<8x8x16xf32>
    %110 = arith.addf %107, %109 : vector<8x8x16xf32>
    %111 = tpu.concatenate %33, %58, %85, %110 in 2 : vector<8x8x16xf32>, vector<8x8x16xf32>, vector<8x8x16xf32>, vector<8x8x16xf32> -> vector<8x8x64xf32>
    %112 = vector.shape_cast %111 : vector<8x8x64xf32> to vector<64x64xf32>
    %113 = arith.truncf %112 : vector<64x64xf32> to vector<64x64xbf16>
    %c0_26 = arith.constant 0 : index
    %c0_27 = arith.constant 0 : index
    %114 = vector.load %arg4[%c0_26, %c0_27] : memref<64x32xbf16, #tpu.memory_space<vmem>>, vector<64x32xbf16>
    %cst_28 = arith.constant dense<0.000000e+00> : vector<64x32xf32>
    %115 = tpu.matmul %113, %114, %cst_28 {dimension_numbers = #tpu.dot_dimension_numbers<[1], [0], [0], [1], [0, 0, 1, 1], [], []>} : vector<64x64xbf16>, vector<64x32xbf16>, vector<64x32xf32> -> vector<64x32xf32>
    %c0_29 = arith.constant 0 : index
    %c0_30 = arith.constant 0 : index
    %116 = vector.load %arg7[%c0_29, %c0_30] : memref<1x32xf32, #tpu.memory_space<vmem>>, vector<1x32xf32>
    %117 = vector.shape_cast %116 : vector<1x32xf32> to vector<32xf32>
    %118 = vector.shape_cast %117 : vector<32xf32> to vector<1x32xf32>
    %119 = vector.broadcast %118 : vector<1x32xf32> to vector<64x32xf32>
    %120 = arith.addf %115, %119 : vector<64x32xf32>
    %121 = vector.shape_cast %120 : vector<64x32xf32> to vector<8x8x32xf32>
    %c0_31 = arith.constant 0 : index
    %c0_32 = arith.constant 0 : index
    %c0_33 = arith.constant 0 : index
    %c0_34 = arith.constant 0 : index
    %122 = vector.load %arg8[%c0_31, %c0_32, %c0_33, %c0_34] : memref<1x8x8x32xf32, #tpu.memory_space<vmem>>, vector<1x8x8x32xf32>
    %123 = vector.shape_cast %122 : vector<1x8x8x32xf32> to vector<8x8x32xf32>
    %124 = vector.shape_cast %121 : vector<8x8x32xf32> to vector<1x8x8x32xf32>
    tpu.vector_store %arg8[%c0_31, %c0_32, %c0_33, %c0_34], %124 {strides = array<i32>} : memref<1x8x8x32xf32, #tpu.memory_space<vmem>>, vector<1x8x8x32xf32>,
    return
  }
  func.func @transform_0(%arg0: i32, %arg1: i32, %arg2: i32) -> (i32, i32, i32, i32) {
    %c0_i32 = arith.constant 0 : i32
    %c0_i32_0 = arith.constant 0 : i32
    %c0_i32_1 = arith.constant 0 : i32
    return %arg0, %arg1, %c0_i32, %c0_i32_0 : i32, i32, i32, i32
  }
  func.func @transform_1(%arg0: i32, %arg1: i32, %arg2: i32) -> (i32, i32) {
    %c0_i32 = arith.constant 0 : i32
    %c0_i32_0 = arith.constant 0 : i32
    return %c0_i32, %arg2 : i32, i32
  }
  func.func @transform_2(%arg0: i32, %arg1: i32, %arg2: i32) -> (i32, i32) {
    %c0_i32 = arith.constant 0 : i32
    %c0_i32_0 = arith.constant 0 : i32
    %c0_i32_1 = arith.constant 0 : i32
    return %c0_i32, %c0_i32_0 : i32, i32
  }
  func.func @transform_3(%arg0: i32, %arg1: i32, %arg2: i32) -> (i32, i32) {
    %c0_i32 = arith.constant 0 : i32
    %c0_i32_0 = arith.constant 0 : i32
    %c0_i32_1 = arith.constant 0 : i32
    return %c0_i32, %c0_i32_0 : i32, i32
  }
  func.func @transform_4(%arg0: i32, %arg1: i32, %arg2: i32) -> (i32, i32) {
    %c0_i32 = arith.constant 0 : i32
    %c0_i32_0 = arith.constant 0 : i32
    return %c0_i32, %arg2 : i32, i32
  }
  func.func @transform_5(%arg0: i32, %arg1: i32, %arg2: i32) -> (i32, i32, i32, i32) {
    %c0_i32 = arith.constant 0 : i32
    %c0_i32_0 = arith.constant 0 : i32
    return %arg0, %arg1, %c0_i32, %arg2 : i32, i32, i32, i32
  }
}

</mosaic_0001>

<bundles_post_ra>
// kernel: tpu_custom_call.1
= control target key start
LH: loop header
LB: loop body
LE: loop exit
PB: predicated region body
PF: predicated region fallthrough
CT: control target
= control target key end

     0   :  { %10 = vsyncpa [#allocation3], 0  ;;  %s2572_s0 = inlined_call_operand.hbm [shape: f32[2,16,8,32], index: 0, kind: input, shape index: {}]   ;;  %s2573_s1 = inlined_call_operand.vmem [shape: bf16[64,32], index: 1, kind: input, shape index: {}]   ;;  %s2574_s2 = inlined_call_operand.vmem [shape: f32[1,16], index: 2, kind: input, shape index: {}]   ;;  %s2575_s3 = inlined_call_operand.vmem [shape: f32[1,16], index: 3, kind: input, shape index: {}]   ;;  %s2576_s4 = inlined_call_operand.vmem [shape: f32[1,32], index: 4, kind: input, shape index: {}]   ;;  %s2577_s5 = inlined_call_operand.hbm [shape: f32[2,8,8,32], index: 5, kind: output, shape index: {}]  }
   0x1   :  { %12 = vsyncpa [#allocation3 + $0x1], 0 }
   0x2   :  { %13 = vsyncpa [#allocation4], 0 }
   0x3   :  { %15 = vsyncpa [#allocation4 + $0x1], 0  ;;  %s1753_s18 = smov 0   ;;  %s1755_s19 = smov 0  }
   0x4   :  { %s1757_s20 = smov 0   ;;  %s1759_s21 = smov 0  }
   0x5   :  { %s1761_s22 = smov 0   ;;  %s1763_s23 = smov 0  }
   0x6 LB: > { %s1351_s24 = sadd.s32 4294967295, %s1712_s23   ;;  %s1352_s25 = sadd.s32 4294967294, %s1712_s23   ;;  %s1712_s23 = sphi %s1763_s23, %s21_s23   ;;  %s1708_s22 = sphi %s1761_s22, %s2592_s22   ;;  %s1704_s21 = sphi %s1759_s21, %s2591_s21   ;;  %s1700_s20 = sphi %s1757_s20, %s2590_s20   ;;  %s1696_s19 = sphi %s1755_s19, %s2589_s19   ;;  %s1692_s18 = sphi %s1753_s18, %s2588_s18  }
   0x7   : > { %s40_s26 = sadd.s32 1, %s1708_s22  ;;  %s49_s27 = sadd.s32 1, %s1700_s20 }
   0x8   : > { %p42_p0 = scmp.ge.s32.totalorder %s40_s26, 2  ;;  %p56_p1 = scmp.ne.s32.totalorder %s1700_s20, %s1696_s19 }
   0x9   : > { %p57_p2 = scmp.eq.s32.totalorder %s1712_s23, 0  ;;  %p62_p3 = scmp.ne.s32.totalorder %s1696_s19, %s1692_s18 }
   0xa   : > { %s2594_s26 = smov (%p42_p0, %s40_s26), 0  ;;  %p63_p5 = scmp.eq.s32.totalorder %s1351_s24, 0 }
   0xb   : > { %p1794_p4 = por %p57_p2, %p56_p1  ;;  %s44_s29 = ssub.s32 %s1708_s22, %s2594_s26 }
   0xc   : > { %p184_p6 = scmp.eq.s32.totalorder %s1351_s24, 1  ;;  %p47_p7 = scmp.eq.s32.totalorder %s44_s29, 0 }
   0xd   : > { %p1800_p8 = por %p63_p5, %p62_p3  ;;  %p190_p10 = scmp.eq.s32.totalorder %s1352_s25, 1 }
   0xe   : > { %p1804_p9 = por %p184_p6, %p56_p1  ;;  %p1425_p13 = scmp.lt.s32.totalorder %s1712_s23, 2 }
   0xf   : > { %s1809_s7 = scalar_select %p47_p7, %s1700_s20, %s49_s27  }
  0x10   : > { %s2581_s6 = scalar_select %p1804_p9, 1, 0 }
  0x11   : > { %p1811_p11 = por %p190_p10, %p62_p3  ;;  %s229_s9 = sand.u32 1, %s1700_s20  }
  0x12   : > { %s1357_s10 = sshll.u32 %s229_s9, 7  ;;  %s1379_s11 = sshll.u32 %s1708_s22, 11 }
  0x13   : > { %s2582_s8 = scalar_select %p1811_p11, 1, 0 }
  0x14   : > { %s1822_s14 = scalar_lea.hbm %s2572_s0, %s1379_s11  ;;  %s233_s15 = scalar_lea.vmem [#allocation2], %s1357_s10 }
  0x15   : > { %s242_s16 = sshll.u32 %s233_s15, 4  ;;  %p1828_p0 = pnand %p1425_p13, %p1794_p4  ;;  %s1824_s16 = int_to_ptr.vmem [resolvable:$true] %s242_s16 }
  0x16   : > { %s1833_s24 = scalar_lea.sflag [#allocation3], %s229_s9  ;;  %s1600_s25 = scalar_lea.hbm %s1822_s14, 2048 }
  0x17   : > { %p1601_p2 = scmp.ne.s32.totalorder %s1822_s14, %s1600_s25  ;;  %p1602_p3 = pneg %p1828_p0 }
  0x18   : > { %s1605_s28 = scalar_lea.hbm %s2572_s0, 4096  ;;  %p1606_p4 = scmp.lt.u32.totalorder %s1822_s14, %s2572_s0 }
  0x19   : > { %p1603_p5 = pnand %p1602_p3, %p1601_p2  ;;  %p1607_p7 = scmp.lt.u32.totalorder %s1605_s28, %s1600_s25 }
  0x1a   : > { %p1609_p13 = scmp.lt.u32.totalorder %s1600_s25, %s1822_s14 }
  0x1b   : > { %p1604_p6 = pneg %p1603_p5  ;;  %p1608_p10 = por %p1607_p7, %p1606_p4 }
  0x1d   : > { %p1610_p12 = por %p1609_p13, %p1608_p10 }
  0x1f   : > { %p1611_p1 = pnand %p1610_p12, %p1604_p6 }
  0x21   : > { %1614 = shalt.err (!%p1611_p1)
}
  0x22   : > { %s1615_s9 = scalar_lea.vmem %s1824_s16, 2048  ;;  %s1714_s12 = smov [#allocation2]  }
  0x23   : > { %p1616_p2 = scmp.ne.s32.totalorder %s1824_s16, %s1615_s9  ;;  %s1620_s13 = sshll.u32 %s1714_s12, 4  ;;  %s1621_s13 = int_to_ptr.vmem [resolvable:$false] %s1620_s13 }
  0x24   : > { %s1622_s15 = scalar_lea.vmem %s1621_s13, 4096  ;;  %p1623_p9 = scmp.lt.s32.totalorder %s1824_s16, %s1621_s13 }
  0x25   : > { %p1618_p5 = pnand %p1616_p2, %p1602_p3  ;;  %p1624_p4 = scmp.lt.s32.totalorder %s1622_s15, %s1615_s9 }
  0x27   : > { %p1619_p11 = pneg %p1618_p5  ;;  %p1625_p7 = por %p1624_p4, %p1623_p9 }
  0x29   : > { %p1626_p10 = pnand %p1625_p7, %p1619_p11 }
  0x2b   : > { %1629 = shalt.err (!%p1626_p10)
}
  0x2c   : > { %s1715_s25 = smov 128   ;;  %s1716_s27 = smov 8  }
  0x2d   : > { %1420 = dma.hbm_to_vmem [thread:$0]  (!%p1828_p0), %s1822_s14, 2048, %s1824_s16, %s1833_s24, %s1715_s25, %s1715_s25, %s1716_s27  }
  0x2e   : > { %p250_p12 = scmp.lt.s32.totalorder %s1712_s23, 3  ;;  %p2584_p1 = scmp.ge.s32.totalorder %s1712_s23, 1 }
  0x30   : > { %p251_p3 = pnand %p2584_p1, %p250_p12 }
  0x31   : > { %s1865_s29 = sand.u32 (!%p251_p3), 1, %s1696_s19  }
  0x32   : > { %254 = sbr.rel (%p251_p3) target bundleno = 779 (0x30b), region = 40  ;;  %s1361_s28 = sshll.u32 (!%p251_p3), %s1865_s29, 7 }
  0x33   : > { %s257_s10 = scalar_lea.sflag (!%p251_p3), [#allocation3], %s1865_s29  ;;  %s1869_s11 = scalar_lea.vmem (!%p251_p3), [#allocation2], %s1361_s28 }
  0x39   : > { %1683 = dma.done.wait (%p1800_p8), %s257_s10, 2048  }
  0x3a   : > { %1685 = vsyncadd (%p1800_p8), %s257_s10, 4294965248  ;;  %v1876_v0 = vld [vmem:[%s1869_s11 + $0x48] sm:$0xff]  ;;  %s1717_s14 = smov 112   ;;  %v1886_v2 = vld [vmem:[%s1869_s11 + $0x58] sm:$0xff]  ;;  %vm322_vm0 = vcmask 130048   ;;  %s1718_s17 = smov 16  }
  0x3b   : > { %v1879_v1 = vld [vmem:[%s1869_s11 + $0x8] sm:$0xff]  ;;  %821 = vrot.lane.b32.xlu1 %v1876_v0, %s1717_s14  ;;  %v1889_v3 = vld [vmem:[%s1869_s11 + $0x18] sm:$0xff]  ;;  %v1929_v10 = vmul.f32 %v1886_v2, %v1886_v2  ;;  %v1933_v11 = vmul.f32 %v1876_v0, %v1876_v0  ;;  %v1964_v16 = vld [vmem:[%s1869_s11 + $0x10] sm:$0xff]  ;;  %v681_v29 = vsel %vm322_vm0, %v1876_v0, 0.0  ;;  %v684_v31 = vsel %vm322_vm0, %v1886_v2, 0.0  ;;  %s1719_s12 = smov 32  }
  0x3c   : > { %813 = vrot.lane.b32.xlu0 %v1879_v1, %s1717_s14  ;;  %v1896_v4 = vld [vmem:[%s1869_s11 + $0x38] sm:$0xff]  ;;  %v1899_v5 = vld [vmem:[%s1869_s11 + $0x28] sm:$0xff]  ;;  %v1917_v8 = vmul.f32 %v1889_v3, %v1889_v3  ;;  %v1921_v9 = vmul.f32 %v1879_v1, %v1879_v1  ;;  %v1967_v17 = vld [vmem:[%s1869_s11] sm:$0xff]  ;;  %v2005_v24 = vmul.f32 %v1964_v16, %v1964_v16  ;;  %v669_v28 = vsel %vm322_vm0, %v1879_v1, 0.0  ;;  %s1362_s9 = sshll.u32 %s1865_s29, 6  ;;  %s1380_s25 = sshll.u32 %s1704_s21, 10 }
  0x3d   : > { %v1906_v6 = vld [vmem:[%s1869_s11 + $0x78] sm:$0xff]  ;;  %v1909_v7 = vld [vmem:[%s1869_s11 + $0x68] sm:$0xff]  ;;  %v1941_v12 = vmul.f32 %v1896_v4, %v1896_v4  ;;  %v1945_v13 = vmul.f32 %v1899_v5, %v1899_v5  ;;  %v1974_v18 = vld [vmem:[%s1869_s11 + $0x50] sm:$0xff]  ;;  %v2009_v25 = vmul.f32 %v1967_v17, %v1967_v17  ;;  %v672_v30 = vsel %vm322_vm0, %v1889_v3, 0.0  ;;  %s293_s15 = scalar_lea.vmem [#allocation5], %s1362_s9  ;;  %s1217_s21 = scalar_lea.sflag [#allocation4], %s1865_s29 }
  0x3e   : > { %v1953_v14 = vmul.f32 %v1906_v6, %v1906_v6  ;;  %v1957_v15 = vmul.f32 %v1909_v7, %v1909_v7  ;;  %v1977_v19 = vld [vmem:[%s1869_s11 + $0x40] sm:$0xff]  ;;  %v1984_v20 = vld [vmem:[%s1869_s11 + $0x30] sm:$0xff]  ;;  %v2017_v26 = vmul.f32 %v1974_v18, %v1974_v18  ;;  %v675_v36 = vsel %vm322_vm0, %v1899_v5, 0.0  ;;  %s1233_s27 = sshll.u32 %s293_s15, 4  ;;  %p2585_p9 = scmp.ne.s32.totalorder %s2581_s6, 0  ;;  %s2520_s27 = int_to_ptr.vmem [resolvable:$true] %s1233_s27 }
  0x3f   : > { %823 = vrot.lane.b32.xlu1 %v1886_v2, %s1717_s14  ;;  %v1987_v21 = vld [vmem:[%s1869_s11 + $0x20] sm:$0xff]  ;;  %v1994_v22 = vld [vmem:[%s1869_s11 + $0x70] sm:$0xff]  ;;  %v2021_v27 = vmul.f32 %v1977_v19, %v1977_v19  ;;  %v2053_v35 = vmul.f32 %v1984_v20, %v1984_v20  ;;  %v687_v37 = vsel %vm322_vm0, %v1909_v7, 0.0  ;;  %v678_v39 = vsel %vm322_vm0, %v1896_v4, 0.0  ;;  %s1630_s30 = scalar_lea.vmem %s2520_s27, 1024 }
  0x40   : > { %815 = vrot.lane.b32.xlu0 %v1889_v3, %s1717_s14  ;;  %v1997_v23 = vld [vmem:[%s1869_s11 + $0x60] sm:$0xff]  ;;  %v2037_v32 = vmul.f32 %v1987_v21, %v1987_v21  ;;  %v2049_v34 = vmul.f32 %v1994_v22, %v1994_v22  ;;  %v690_v40 = vsel %vm322_vm0, %v1906_v6, 0.0  ;;  %v709_v47 = vsel %vm322_vm0, %v1921_v9, 0.0  ;;  %p1631_p8 = scmp.ne.s32.totalorder %s2520_s27, %s1630_s30 }
  0x41   : > { %v2043_v33 = vmul.f32 %v1997_v23, %v1997_v23  ;;  %v712_v49 = vsel %vm322_vm0, %v1917_v8, 0.0  ;;  %v721_v50 = vsel %vm322_vm0, %v1933_v11, 0.0  ;;  %v724_v52 = vsel %vm322_vm0, %v1929_v10, 0.0 }
  0x42   : > { %v715_v59 = vsel %vm322_vm0, %v1945_v13, 0.0  ;;  %v718_v62 = vsel %vm322_vm0, %v1941_v12, 0.0  ;;  %vm1069_vm1 = vcmask 261120   ;;  %vm1078_vm2 = vcmask 392192   ;;  %p1632_p11 = pnand %p1631_p8, %p2585_p9 }
  0x43   : > { %819 = vrot.lane.b32.xlu1 %v1896_v4, %s1717_s14  ;;  %vm1130_vm3 = vcmask 523264  }
  0x44   : > { %817 = vrot.lane.b32.xlu0 %v1899_v5, %s1717_s14  ;;  %p1633_p0 = pneg %p1632_p11 }
  0x47   : > { %827 = vrot.lane.b32.xlu1 %v1906_v6, %s1717_s14 }
  0x48   : > { %825 = vrot.lane.b32.xlu0 %v1909_v7, %s1717_s14 }
  0x4b   : > { %879 = vrot.lane.b32.xlu1 %v1917_v8, %s1717_s14  ;;  %v727_v8 = vsel %vm322_vm0, %v1957_v15, 0.0 }
  0x4c   : > { %877 = vrot.lane.b32.xlu0 %v1921_v9, %s1717_s14 }
  0x4f   : > { %887 = vrot.lane.b32.xlu1 %v1929_v10, %s1717_s14  ;;  %v730_v10 = vsel %vm322_vm0, %v1953_v14, 0.0 }
  0x50   : > { %885 = vrot.lane.b32.xlu0 %v1933_v11, %s1717_s14 }
  0x53   : > { %883 = vrot.lane.b32.xlu1 %v1941_v12, %s1717_s14 }
  0x54   : > { %881 = vrot.lane.b32.xlu0 %v1945_v13, %s1717_s14 }
  0x57   : > { %891 = vrot.lane.b32.xlu1 %v1953_v14, %s1717_s14 }
  0x58   : > { %889 = vrot.lane.b32.xlu0 %v1957_v15, %s1717_s14 }
  0x5b   : > { %481 = vrot.lane.b32.xlu1 %v1964_v16, %s1717_s14 }
  0x5c   : > { %479 = vrot.lane.b32.xlu0 %v1967_v17, %s1717_s14 }
  0x5f   : > { %489 = vrot.lane.b32.xlu1 %v1974_v18, %s1717_s14 }
  0x60   : > { %487 = vrot.lane.b32.xlu0 %v1977_v19, %s1717_s14 }
  0x63   : > { %485 = vrot.lane.b32.xlu1 %v1984_v20, %s1717_s14 }
  0x64   : > { %483 = vrot.lane.b32.xlu0 %v1987_v21, %s1717_s14 }
  0x67   : > { %493 = vrot.lane.b32.xlu1 %v1994_v22, %s1717_s14 }
  0x68   : > { %491 = vrot.lane.b32.xlu0 %v1997_v23, %s1717_s14 }
  0x6b   : > { %545 = vrot.lane.b32.xlu1 %v2005_v24, %s1717_s14 }
  0x6c   : > { %543 = vrot.lane.b32.xlu0 %v2009_v25, %s1717_s14 }
  0x6f   : > { %553 = vrot.lane.b32.xlu1 %v2017_v26, %s1717_s14 }
  0x70   : > { %551 = vrot.lane.b32.xlu0 %v2021_v27, %s1717_s14 }
  0x8f   : > { %670 = vadd.xlane.f32.xlu0 %v669_v28 }
  0x93   : > { %682 = vadd.xlane.f32.xlu0 %v681_v29  ;;  %673 = vadd.xlane.f32.xlu1 %v672_v30 }
  0x97   : > { %685 = vadd.xlane.f32.xlu0 %v684_v31 }
  0xa4   : > { %547 = vrot.lane.b32.xlu1 %v2037_v32, %s1717_s14 }
  0xa8   : > { %555 = vrot.lane.b32.xlu1 %v2043_v33, %s1717_s14 }
  0xac   : > { %557 = vrot.lane.b32.xlu1 %v2049_v34, %s1717_s14 }
  0xad   : > { %549 = vrot.lane.b32.xlu0 %v2053_v35, %s1717_s14  ;;  %v822_v41 = vpop.permute.xlu1 %821  ;;  %s2518_s14 = scalar_lea.hbm %s2577_s5, %s1380_s25 }
  0xae   : > { %v814_v38 = vpop.permute.xlu0 %813  ;;  %v849_v46 = vsel %vm322_vm0, %v822_v41, 0.0  ;;  %v2108_v41 = vld [vmem:[%s2575_s3] ss:$0 sm:$0xff] }
  0xaf   : > { %v837_v43 = vsel %vm322_vm0, %v814_v38, 0.0 }
  0xb1   : > { %v824_v45 = vpop.permute.xlu1 %823 }
  0xb2   : > { %v816_v42 = vpop.permute.xlu0 %815  ;;  %v852_v48 = vsel %vm322_vm0, %v824_v45, 0.0 }
  0xb3   : > { %v840_v44 = vsel %vm322_vm0, %v816_v42, 0.0 }
  0xb5   : > { %v820_v53 = vpop.permute.xlu1 %819 }
  0xb6   : > { %v818_v51 = vpop.permute.xlu0 %817  ;;  %v846_v56 = vsel %vm322_vm0, %v820_v53, 0.0 }
  0xb7   : > { %v843_v54 = vsel %vm322_vm0, %v818_v51, 0.0  ;;  %v335_v51 = vsel %vm322_vm0, %v1977_v19, 0.0 }
  0xb9   : > { %v828_v57 = vpop.permute.xlu1 %827 }
  0xba   : > { %v826_v55 = vpop.permute.xlu0 %825  ;;  %v858_v61 = vsel %vm322_vm0, %v828_v57, 0.0 }
  0xbb   : > { %v855_v58 = vsel %vm322_vm0, %v826_v55, 0.0 }
  0xbd   : > { %v880_v63 = vpop.permute.xlu1 %879 }
  0xbe   : > { %v878_v60 = vpop.permute.xlu0 %877  ;;  %v904_v29 = vsel %vm322_vm0, %v880_v63, 0.0 }
  0xbf   : > { %v901_v13 = vsel %vm322_vm0, %v878_v60, 0.0 }
  0xc1   : > { %v888_v11 = vpop.permute.xlu1 %887 }
  0xc2   : > { %v886_v9 = vpop.permute.xlu0 %885  ;;  %v916_v15 = vsel %vm322_vm0, %v888_v11, 0.0 }
  0xc3   : > { %v913_v12 = vsel %vm322_vm0, %v886_v9, 0.0 }
  0xc5   : > { %v884_v30 = vpop.permute.xlu1 %883 }
  0xc6   : > { %v882_v28 = vpop.permute.xlu0 %881  ;;  %v910_v14 = vsel %vm322_vm0, %v884_v30, 0.0 }
  0xc7   : > { %v907_v31 = vsel %vm322_vm0, %v882_v28, 0.0 }
  0xcc   : > { %676 = vadd.xlane.f32.xlu0 %v675_v36  ;;  %v890_v36 = vpop.permute.xlu0 %889 }
  0xcd   : > { %v919_v38 = vsel %vm322_vm0, %v890_v36, 0.0 }
  0xd0   : > { %688 = vadd.xlane.f32.xlu0 %v687_v37  ;;  %679 = vadd.xlane.f32.xlu1 %v678_v39  ;;  %v892_v37 = vpop.permute.xlu1 %891  ;;  %v480_v42 = vpop.permute.xlu0 %479 }
  0xd1   : > { %v922_v39 = vsel %vm322_vm0, %v892_v37, 0.0  ;;  %v503_v55 = vsel %vm322_vm0, %v480_v42, 0.0 }
  0xd4   : > { %691 = vadd.xlane.f32.xlu0 %v690_v40  ;;  %838 = vadd.xlane.f32.xlu1 %v837_v43  ;;  %v2102_v40 = vld [vmem:[%s2574_s2] ss:$0 sm:$0xff]  ;;  %v482_v43 = vpop.permute.xlu1 %481 }
  0xd5   : > { %v506_v57 = vsel %vm322_vm0, %v482_v43, 0.0 }
  0xd8   : > { %841 = vadd.xlane.f32.xlu0 %v840_v44  ;;  %850 = vadd.xlane.f32.xlu1 %v849_v46  ;;  %v488_v44 = vpop.permute.xlu0 %487  ;;  %v490_v45 = vpop.permute.xlu1 %489 }
  0xd9   : > { %v518_v60 = vsel %vm322_vm0, %v490_v45, 0.0 }
  0xdc   : > { %853 = vadd.xlane.f32.xlu0 %v852_v48  ;;  %710 = vadd.xlane.f32.xlu1 %v709_v47  ;;  %v484_v46 = vpop.permute.xlu0 %483  ;;  %v486_v47 = vpop.permute.xlu1 %485 }
  0xdd   : > { %v512_v11 = vsel %vm322_vm0, %v486_v47, 0.0 }
  0xe0   : > { %713 = vadd.xlane.f32.xlu0 %v712_v49  ;;  %722 = vadd.xlane.f32.xlu1 %v721_v50  ;;  %v492_v48 = vpop.permute.xlu0 %491  ;;  %v323_v49 = vsel %vm322_vm0, %v1967_v17, 0.0  ;;  %v326_v50 = vsel %vm322_vm0, %v1964_v16, 0.0  ;;  %v515_v16 = vsel %vm322_vm0, %v488_v44, 0.0  ;;  %v372_v44 = vsel %vm322_vm0, %v2053_v35, 0.0 }
  0xe4   : > { %725 = vadd.xlane.f32.xlu0 %v724_v52  ;;  %844 = vadd.xlane.f32.xlu1 %v843_v54  ;;  %v494_v52 = vpop.permute.xlu1 %493  ;;  %v544_v53 = vpop.permute.xlu0 %543  ;;  %v338_v54 = vsel %vm322_vm0, %v1974_v18, 0.0  ;;  %v332_v18 = vsel %vm322_vm0, %v1984_v20, 0.0  ;;  %v521_v20 = vsel %vm322_vm0, %v492_v48, 0.0 }
  0xe5   : > { %v524_v28 = vsel %vm322_vm0, %v494_v52, 0.0  ;;  %v567_v36 = vsel %vm322_vm0, %v544_v53, 0.0 }
  0xe8   : > { %847 = vadd.xlane.f32.xlu0 %v846_v56  ;;  %856 = vadd.xlane.f32.xlu1 %v855_v58  ;;  %v546_v56 = vpop.permute.xlu1 %545  ;;  %v552_v17 = vpop.permute.xlu0 %551  ;;  %v329_v58 = vsel %vm322_vm0, %v1987_v21, 0.0  ;;  %v509_v21 = vsel %vm322_vm0, %v484_v46, 0.0  ;;  %v381_v46 = vsel %vm322_vm0, %v2043_v33, 0.0 }
  0xe9   : > { %v579_v37 = vsel %vm322_vm0, %v552_v17, 0.0 }
  0xec   : > { %859 = vadd.xlane.f32.xlu0 %v858_v61  ;;  %716 = vadd.xlane.f32.xlu1 %v715_v59  ;;  %v554_v59 = vpop.permute.xlu1 %553  ;;  %v341_v61 = vsel %vm322_vm0, %v1997_v23, 0.0  ;;  %v363_v23 = vsel %vm322_vm0, %v2009_v25, 0.0  ;;  %v378_v25 = vsel %vm322_vm0, %v2017_v26, 0.0  ;;  %v369_v26 = vsel %vm322_vm0, %v2037_v32, 0.0 }
  0xf0   : > { %719 = vadd.xlane.f32.xlu0 %v718_v62  ;;  %728 = vadd.xlane.f32.xlu1 %v727_v8  ;;  %v344_v8 = vsel %vm322_vm0, %v1994_v22, 0.0  ;;  %v366_v22 = vsel %vm322_vm0, %v2005_v24, 0.0  ;;  %v570_v24 = vsel %vm322_vm0, %v546_v56, 0.0 }
  0xf4   : > { %731 = vadd.xlane.f32.xlu0 %v730_v10  ;;  %902 = vadd.xlane.f32.xlu1 %v901_v13 }
  0xf8   : > { %905 = vadd.xlane.f32.xlu0 %v904_v29  ;;  %914 = vadd.xlane.f32.xlu1 %v913_v12  ;;  %v375_v12 = vsel %vm322_vm0, %v2021_v27, 0.0 }
  0xfc   : > { %917 = vadd.xlane.f32.xlu0 %v916_v15  ;;  %908 = vadd.xlane.f32.xlu1 %v907_v31 }
 0x100   : > { %911 = vadd.xlane.f32.xlu0 %v910_v14  ;;  %920 = vadd.xlane.f32.xlu1 %v919_v38 }
 0x104   : > { %923 = vadd.xlane.f32.xlu0 %v922_v39  ;;  %v582_v39 = vsel %vm322_vm0, %v554_v59, 0.0 }
 0x111   : > { %647 = vrot.lane.b32.xlu1 %v2102_v40, %s1718_s17 }
 0x11a   : > { %658 = vrot.lane.b32.xlu0 %v2108_v41, %s1718_s17 }
 0x11c   : > { %v671_v19 = vpop.xlane.xlu0 %670 }
 0x11d   : > { %v693_v45 = vmul.f32 0.0625, %v671_v19 }
 0x120   : > { %v674_v62 = vpop.xlane.xlu1 %673  ;;  %v683_v63 = vpop.xlane.xlu0 %682 }
 0x121   : > { %v2169_v48 = vmul.f32 0.0625, %v674_v62 }
 0x123   : > { %v742_v33 = vmul.f32 %v2169_v48, %v2169_v48 }
 0x124   : > { %v548_v9 = vpop.permute.xlu1 %547  ;;  %v686_v10 = vpop.xlane.xlu0 %685 }
 0x128   : > { %v556_v13 = vpop.permute.xlu1 %555  ;;  %v550_v29 = vpop.permute.xlu0 %549 }
 0x12c   : > { %v558_v15 = vpop.permute.xlu1 %557 }
 0x135   : > { %324 = vadd.xlane.f32.xlu1 %v323_v49  ;;  %v384_v49 = vsel %vm322_vm0, %v2049_v34, 0.0 }
 0x139   : > { %327 = vadd.xlane.f32.xlu0 %v326_v50  ;;  %336 = vadd.xlane.f32.xlu1 %v335_v51  ;;  %v741_v50 = vmul.f32 %v693_v45, %v693_v45  ;;  %v2173_v51 = vmul.f32 0.0625, %v683_v63 }
 0x13b   : > { %v745_v34 = vmul.f32 %v2173_v51, %v2173_v51 }
 0x13d   : > { %339 = vadd.xlane.f32.xlu0 %v338_v54  ;;  %504 = vadd.xlane.f32.xlu1 %v503_v55  ;;  %v573_v54 = vsel %vm322_vm0, %v548_v9, 0.0  ;;  %v2178_v55 = vmul.f32 0.0625, %v686_v10  ;;  %v588_v9 = vsel %vm322_vm0, %v558_v15, 0.0 }
 0x141   : > { %507 = vadd.xlane.f32.xlu0 %v506_v57  ;;  %516 = vadd.xlane.f32.xlu1 %v515_v16 }
 0x145   : > { %519 = vadd.xlane.f32.xlu0 %v518_v60  ;;  %330 = vadd.xlane.f32.xlu1 %v329_v58  ;;  %v576_v58 = vsel %vm322_vm0, %v550_v29, 0.0  ;;  %v757_v29 = vsub.f32 %v1879_v1, %v693_v45 }
 0x149   : > { %333 = vadd.xlane.f32.xlu0 %v332_v18  ;;  %342 = vadd.xlane.f32.xlu1 %v341_v61  ;;  %v585_v18 = vsel %vm322_vm0, %v556_v13, 0.0  ;;  %v746_v61 = vmul.f32 %v2178_v55, %v2178_v55 }
 0x14d   : > { %345 = vadd.xlane.f32.xlu0 %v344_v8  ;;  %510 = vadd.xlane.f32.xlu1 %v509_v21 }
 0x151   : > { %513 = vadd.xlane.f32.xlu0 %v512_v11  ;;  %522 = vadd.xlane.f32.xlu1 %v521_v20 }
 0x155   : > { %525 = vadd.xlane.f32.xlu0 %v524_v28  ;;  %364 = vadd.xlane.f32.xlu1 %v363_v23 }
 0x159   : > { %367 = vadd.xlane.f32.xlu0 %v366_v22  ;;  %v2141_v30 = vpop.xlane.xlu0 %676  ;;  %376 = vadd.xlane.f32.xlu1 %v375_v12 }
 0x15a   : > { %v2194_v13 = vmul.f32 0.0625, %v2141_v30 }
 0x15d   : > { %379 = vadd.xlane.f32.xlu0 %v378_v25  ;;  %v2145_v31 = vpop.xlane.xlu0 %688  ;;  %v2148_v14 = vpop.xlane.xlu1 %679  ;;  %568 = vadd.xlane.f32.xlu1 %v567_v36  ;;  %v743_v36 = vmul.f32 %v2194_v13, %v2194_v13 }
 0x15e   : > { %v2200_v22 = vmul.f32 0.0625, %v2145_v31  ;;  %v2203_v12 = vmul.f32 0.0625, %v2148_v14  ;;  %v758_v31 = vsub.f32 %v1889_v3, %v2169_v48  ;;  %v762_v14 = vsub.f32 %v1886_v2, %v2178_v55 }
 0x161   : > { %571 = vadd.xlane.f32.xlu0 %v570_v24  ;;  %v2151_v27 = vpop.xlane.xlu0 %691  ;;  %v2154_v38 = vpop.xlane.xlu1 %838  ;;  %580 = vadd.xlane.f32.xlu1 %v579_v37  ;;  %v761_v37 = vsub.f32 %v1876_v0, %v2173_v51 }
 0x162   : > { %v2208_v24 = vmul.f32 0.0625, %v2151_v27  ;;  %v747_v27 = vmul.f32 %v2200_v22, %v2200_v22 }
 0x165   : > { %583 = vadd.xlane.f32.xlu0 %v582_v39  ;;  %v2159_v42 = vpop.xlane.xlu0 %841  ;;  %v2161_v43 = vpop.xlane.xlu1 %850  ;;  %370 = vadd.xlane.f32.xlu1 %v369_v26  ;;  %v2217_v39 = vmul.f32 0.0625, %v2154_v38 }
 0x169   : > { %373 = vadd.xlane.f32.xlu0 %v372_v44  ;;  %v2167_v47 = vpop.xlane.xlu0 %853  ;;  %v711_v32 = vpop.xlane.xlu1 %710  ;;  %382 = vadd.xlane.f32.xlu1 %v381_v46 }
 0x16a   : > { %v733_v52 = vmul.f32 0.0625, %v711_v32  ;;  %v744_v32 = vmul.f32 %v2203_v12, %v2203_v12 }
 0x16c   : > { %v749_v53 = vsub.f32 %v733_v52, %v741_v50  ;;  %v748_v52 = vmul.f32 %v2208_v24, %v2208_v24 }
 0x16d   : > { %385 = vadd.xlane.f32.xlu0 %v384_v49  ;;  %v714_v35 = vpop.xlane.xlu0 %713  ;;  %v723_v17 = vpop.xlane.xlu1 %722  ;;  %574 = vadd.xlane.f32.xlu1 %v573_v54  ;;  %v2227_v54 = vmul.f32 0.0625, %v2159_v42 }
 0x16e   : > { %v734_v56 = vmul.f32 0.0625, %v714_v35  ;;  %v765_v57 = vadd.f32 1e-05, %v749_v53  ;;  %v737_v16 = vmul.f32 0.0625, %v723_v17  ;;  %v933_v17 = vmul.f32 %v2217_v39, %v2217_v39 }
 0x170   : > { %v750_v19 = vsub.f32 %v734_v56, %v742_v33  ;;  %1526 = vrsqrt.f32 %v765_v57  ;;  %v753_v59 = vsub.f32 %v737_v16, %v745_v34  ;;  %v2230_v33 = vmul.f32 0.0625, %v2161_v43 }
 0x171   : > { %577 = vadd.xlane.f32.xlu0 %v576_v58  ;;  %v726_v60 = vpop.xlane.xlu0 %725  ;;  %v2186_v8 = vpop.xlane.xlu1 %844  ;;  %586 = vadd.xlane.f32.xlu1 %v585_v18 }
 0x172   : > { %v766_v62 = vadd.f32 1e-05, %v750_v19  ;;  %v738_v63 = vmul.f32 0.0625, %v726_v60  ;;  %v769_v21 = vadd.f32 1e-05, %v753_v59 }
 0x174   : > { %1528 = vrsqrt.f32 %v766_v62  ;;  %v754_v10 = vsub.f32 %v738_v63, %v746_v61 }
 0x175   : > { %1530 = vrsqrt.f32 %v769_v21  ;;  %589 = vadd.xlane.f32.xlu0 %v588_v9  ;;  %v2189_v11 = vpop.xlane.xlu0 %847  ;;  %v2191_v23 = vpop.xlane.xlu1 %856  ;;  %v934_v21 = vmul.f32 %v2227_v54, %v2227_v54  ;;  %v937_v9 = vmul.f32 %v2230_v33, %v2230_v33 }
 0x176   : > { %v770_v20 = vadd.f32 1e-05, %v754_v10 }
 0x178   : > { %1532 = vrsqrt.f32 %v770_v20 }
 0x179   : > { %v2196_v28 = vpop.xlane.xlu0 %859  ;;  %v717_v15 = vpop.xlane.xlu1 %716 }
 0x17a   : > { %v1527_v25 = vpop.eup %1526  ;;  %v735_v30 = vmul.f32 0.0625, %v717_v15 }
 0x17b   : > { %v781_v26 = vmul.f32 %v1527_v25, %v757_v29 }
 0x17c   : > { %v751_v44 = vsub.f32 %v735_v30, %v743_v36  ;;  %v2244_v36 = vmul.f32 0.0625, %v2167_v47  ;;  %v2247_v30 = vmul.f32 0.0625, %v2186_v8  ;;  %v2255_v8 = vmul.f32 0.0625, %v2189_v11 }
 0x17d   : > { %v720_v45 = vpop.xlane.xlu0 %719  ;;  %v729_v50 = vpop.xlane.xlu1 %728  ;;  %v789_v51 = vmul.f32 %v2102_v40, %v781_v26 }
 0x17e   : > { %v1529_v46 = vpop.eup %1528  ;;  %v736_v49 = vmul.f32 0.0625, %v720_v45  ;;  %v767_v53 = vadd.f32 1e-05, %v751_v44  ;;  %v739_v38 = vmul.f32 0.0625, %v729_v50 }
 0x17f   : > { %v1531_v48 = vpop.eup %1530  ;;  %v782_v35 = vmul.f32 %v1529_v46, %v758_v31  ;;  %v797_v42 = vadd.f32 %v2108_v41, %v789_v51  ;;  %v938_v51 = vmul.f32 %v2244_v36, %v2244_v36 }
 0x180   : > { %v752_v55 = vsub.f32 %v736_v49, %v744_v32  ;;  %v785_v56 = vmul.f32 %v1531_v48, %v761_v37  ;;  %1534 = vrsqrt.f32 %v767_v53  ;;  %v755_v34 = vsub.f32 %v739_v38, %v747_v27 }
 0x181   : > { %v732_v57 = vpop.xlane.xlu0 %731  ;;  %v790_v16 = vmul.f32 %v2102_v40, %v782_v35  ;;  %v903_v60 = vpop.xlane.xlu1 %902  ;;  %v759_v27 = vsub.f32 %v1899_v5, %v2194_v13  ;;  %v2260_v48 = vmul.f32 0.0625, %v2191_v23  ;;  %v935_v13 = vmul.f32 %v2247_v30, %v2247_v30 }
 0x182   : > { %v1533_v19 = vpop.eup %1532  ;;  %v768_v58 = vadd.f32 1e-05, %v752_v55  ;;  %v740_v59 = vmul.f32 0.0625, %v732_v57  ;;  %v793_v18 = vmul.f32 %v2102_v40, %v785_v56  ;;  %v771_v43 = vadd.f32 1e-05, %v755_v34 }
 0x183   : > { %v925_v61 = vmul.f32 0.0625, %v903_v60  ;;  %v798_v62 = vadd.f32 %v2108_v41, %v790_v16  ;;  %v786_v63 = vmul.f32 %v1533_v19, %v762_v14  ;;  %v763_v56 = vsub.f32 %v1909_v7, %v2200_v22 }
 0x184   : > { %1536 = vrsqrt.f32 %v768_v58  ;;  %v756_v10 = vsub.f32 %v740_v59, %v748_v52  ;;  %v801_v45 = vadd.f32 %v2108_v41, %v793_v18  ;;  %v760_v23 = vsub.f32 %v1896_v4, %v2203_v12  ;;  %v1522_v58 = vld [vmem:[%s2573_s1] sm:$0xff]  }
 0x185   : > { %1538 = vrsqrt.f32 %v771_v43  ;;  %v941_v20 = vsub.f32 %v925_v61, %v933_v17  ;;  %v906_v29 = vpop.xlane.xlu0 %905  ;;  %v1482_v15 = vpack.i.bf16 %v798_v62, %v797_v42  ;;  %v794_v25 = vmul.f32 %v2102_v40, %v786_v63  ;;  %v915_v31 = vpop.xlane.xlu1 %914  ;;  %1389 = vmatprep.subr.bf16.mxu0 %v1522_v58  ;;  %1405 = vmatprep.subr.bf16.mxu1 %v1522_v58 }
 0x186   : > { %v772_v37 = vadd.f32 1e-05, %v756_v10  ;;  %v926_v26 = vmul.f32 0.0625, %v906_v29  ;;  %v929_v44 = vmul.f32 0.0625, %v915_v31  ;;  %v936_v57 = vmul.f32 %v2255_v8, %v2255_v8  ;;  %1390 = vmatpush3.bf16.msra.mxu0 %v1522_v58  ;;  %1409 = vmatpush3.bf16.msra.mxu1 %v1522_v58 }
 0x187   : > { %v957_v14 = vadd.f32 1e-05, %v941_v20  ;;  %1483 = vrot.lane.b32.xlu1 %v1482_v15, %s1719_s12  ;;  %v802_v46 = vadd.f32 %v2108_v41, %v794_v25  ;;  %v939_v22 = vmul.f32 %v2260_v48, %v2260_v48  ;;  %v2277_v60 = vmul.f32 0.0625, %v2196_v28 }
 0x188   : > { %1540 = vrsqrt.f32 %v772_v37  ;;  %v942_v47 = vsub.f32 %v926_v26, %v934_v21  ;;  %v945_v32 = vsub.f32 %v929_v44, %v937_v9  ;;  %v764_v9 = vsub.f32 %v1906_v6, %v2208_v24  ;;  %v1523_v37 = vld [vmem:[%s2573_s1 + $0x8] sm:$0xff]  }
 0x189   : > { %1542 = vrsqrt.f32 %v957_v14  ;;  %v918_v49 = vpop.xlane.xlu0 %917  ;;  %v1487_v50 = vpack.i.bf16 %v802_v46, %v801_v45  ;;  %v909_v38 = vpop.xlane.xlu1 %908  ;;  %v949_v28 = vsub.f32 %v1879_v1, %v2217_v39  ;;  %v940_v24 = vmul.f32 %v2277_v60, %v2277_v60  ;;  %1391 = vmatprep.subr.bf16.mxu0 %v1523_v37  ;;  %1406 = vmatprep.subr.bf16.mxu1 %v1523_v37 }
 0x18a   : > { %v958_v52 = vadd.f32 1e-05, %v942_v47  ;;  %v930_v53 = vmul.f32 0.0625, %v918_v49  ;;  %v1535_v35 = vpop.eup %1534  ;;  %v961_v55 = vadd.f32 1e-05, %v945_v32  ;;  %v927_v11 = vmul.f32 0.0625, %v909_v38  ;;  %1392 = vmatpush3.bf16.msra.mxu0 %v1523_v37  ;;  %1410 = vmatpush3.bf16.msra.mxu1 %v1523_v37 }
 0x18b   : > { %1488 = vrot.lane.b32.xlu0 %v1487_v50, %s1719_s12  ;;  %v783_v34 = vmul.f32 %v1535_v35, %v759_v27  ;;  %v950_v49 = vsub.f32 %v1889_v3, %v2227_v54  ;;  %v953_v38 = vsub.f32 %v1876_v0, %v2230_v33  ;;  %v954_v0 = vsub.f32 %v1886_v2, %v2244_v36  ;;  %v1525_v36 = vld [vmem:[%s2573_s1 + $0x18] sm:$0xff]  }
 0x18c   : > { %1544 = vrsqrt.f32 %v958_v52  ;;  %v946_v17 = vsub.f32 %v930_v53, %v938_v51  ;;  %v943_v16 = vsub.f32 %v927_v11, %v935_v13  ;;  %v1524_v52 = vld [vmem:[%s2573_s1 + $0x10] sm:$0xff]  }
 0x18d   : > { %1546 = vrsqrt.f32 %v961_v55  ;;  %v912_v19 = vpop.xlane.xlu0 %911  ;;  %v921_v12 = vpop.xlane.xlu1 %920  ;;  %v791_v21 = vmul.f32 %v2102_v40, %v783_v34  ;;  %1393 = vmatprep.subr.bf16.mxu0 %v1524_v52  ;;  %1407 = vmatprep.subr.bf16.mxu1 %v1524_v52 }
 0x18e   : > { %v1537_v59 = vpop.eup %1536  ;;  %v962_v42 = vadd.f32 1e-05, %v946_v17  ;;  %v928_v18 = vmul.f32 0.0625, %v912_v19  ;;  %v959_v61 = vadd.f32 1e-05, %v943_v16  ;;  %v931_v62 = vmul.f32 0.0625, %v921_v12  ;;  %1394 = vmatpush3.bf16.msra.mxu0 %v1524_v52  ;;  %1411 = vmatpush3.bf16.msra.mxu1 %v1524_v52 }
 0x18f   : > { %v1539_v43 = vpop.eup %1538  ;;  %v784_v63 = vmul.f32 %v1537_v59, %v760_v23  ;;  %v799_v1 = vadd.f32 %v2108_v41, %v791_v21  ;;  %1395 = vmatprep.subr.bf16.mxu0 %v1525_v36  ;;  %1408 = vmatprep.subr.bf16.mxu1 %v1525_v36 }
 0x190   : > { %1548 = vrsqrt.f32 %v962_v42  ;;  %v944_v10 = vsub.f32 %v928_v18, %v936_v57  ;;  %v787_v20 = vmul.f32 %v1539_v43, %v763_v56  ;;  %v947_v29 = vsub.f32 %v931_v62, %v939_v22 }
 0x191   : > { %1550 = vrsqrt.f32 %v959_v61  ;;  %v924_v15 = vpop.xlane.xlu0 %923  ;;  %v792_v25 = vmul.f32 %v2102_v40, %v784_v63  ;;  %v2301_v13 = vpop.permute.xlu1 %647  ;;  %v951_v57 = vsub.f32 %v1899_v5, %v2247_v30  ;;  %v952_v5 = vsub.f32 %v1896_v4, %v2255_v8 }
 0x192   : > { %v1541_v26 = vpop.eup %1540  ;;  %v960_v31 = vadd.f32 1e-05, %v944_v10  ;;  %v932_v14 = vmul.f32 0.0625, %v924_v15  ;;  %v795_v44 = vmul.f32 %v2102_v40, %v787_v20  ;;  %v963_v46 = vadd.f32 1e-05, %v947_v29  ;;  %1396 = vmatpush3.bf16.msra.mxu0 %v1525_v36  ;;  %1412 = vmatpush3.bf16.msra.mxu1 %v1525_v36 }
 0x193   : > { %v1543_v45 = vpop.eup %1542  ;;  %v800_v39 = vadd.f32 %v2108_v41, %v792_v25  ;;  %v788_v27 = vmul.f32 %v1541_v26, %v764_v9  ;;  %v955_v43 = vsub.f32 %v1909_v7, %v2260_v48  ;;  %v956_v9 = vsub.f32 %v1906_v6, %v2277_v60 }
 0x194   : > { %1552 = vrsqrt.f32 %v960_v31  ;;  %v948_v47 = vsub.f32 %v932_v14, %v940_v24  ;;  %v973_v32 = vmul.f32 %v1543_v45, %v949_v28  ;;  %v803_v55 = vadd.f32 %v2108_v41, %v795_v44 }
 0x195   : > { %1554 = vrsqrt.f32 %v963_v46  ;;  %v1492_v50 = vpack.i.bf16 %v800_v39, %v799_v1  ;;  %v796_v51 = vmul.f32 %v2102_v40, %v788_v27  ;;  %v2312_v16 = vpop.permute.xlu0 %658 }
 0x196   : > { %v1545_v53 = vpop.eup %1544  ;;  %v964_v35 = vadd.f32 1e-05, %v948_v47  ;;  %v981_v56 = vmul.f32 %v973_v32, %v2301_v13 }
 0x197   : > { %v1547_v11 = vpop.eup %1546  ;;  %1493 = vrot.lane.b32.xlu1 %v1492_v50, %s1719_s12  ;;  %v804_v3 = vadd.f32 %v2108_v41, %v796_v51  ;;  %v974_v54 = vmul.f32 %v1545_v53, %v950_v49 }
 0x198   : > { %1556 = vrsqrt.f32 %v964_v35  ;;  %v977_v17 = vmul.f32 %v1547_v11, %v953_v38  ;;  %v989_v58 = vadd.f32 %v981_v56, %v2312_v16 }
 0x199   : > { %v1497_v33 = vpack.i.bf16 %v804_v3, %v803_v55  ;;  %v982_v34 = vmul.f32 %v974_v54, %v2301_v13 }
 0x19a   : > { %v1549_v23 = vpop.eup %1548  ;;  %v985_v2 = vmul.f32 %v977_v17, %v2301_v13 }
 0x19b   : > { %v1551_v19 = vpop.eup %1550  ;;  %1498 = vrot.lane.b32.xlu1 %v1497_v33, %s1719_s12  ;;  %v990_v59 = vadd.f32 %v982_v34, %v2312_v16  ;;  %v978_v22 = vmul.f32 %v1549_v23, %v954_v0 }
 0x19c   : > { %v975_v42 = vmul.f32 %v1551_v19, %v951_v57  ;;  %v993_v62 = vadd.f32 %v985_v2, %v2312_v16 }
 0x19d   : > { %v1502_v30 = vpack.i.bf16 %v990_v59, %v989_v58  ;;  %v986_v18 = vmul.f32 %v978_v22, %v2301_v13 }
 0x19e   : > { %v1553_v12 = vpop.eup %1552  ;;  %v983_v4 = vmul.f32 %v975_v42, %v2301_v13 }
 0x19f   : > { %v1555_v61 = vpop.eup %1554  ;;  %1503 = vrot.lane.b32.xlu0 %v1502_v30, %s1719_s12  ;;  %v994_v63 = vadd.f32 %v986_v18, %v2312_v16  ;;  %v976_v21 = vmul.f32 %v1553_v12, %v952_v5 }
 0x1a0   : > { %v979_v8 = vmul.f32 %v1555_v61, %v955_v43  ;;  %v991_v48 = vadd.f32 %v983_v4, %v2312_v16 }
 0x1a1   : > { %v1507_v10 = vpack.i.bf16 %v994_v63, %v993_v62  ;;  %v984_v20 = vmul.f32 %v976_v21, %v2301_v13 }
 0x1a2   : > { %v1557_v7 = vpop.eup %1556  ;;  %v987_v15 = vmul.f32 %v979_v8, %v2301_v13 }
 0x1a3   : > { %1508 = vrot.lane.b32.xlu1 %v1507_v10, %s1719_s12  ;;  %v992_v28 = vadd.f32 %v984_v20, %v2312_v16  ;;  %v980_v29 = vmul.f32 %v1557_v7, %v956_v9 }
 0x1a4   : > { %v995_v6 = vadd.f32 %v987_v15, %v2312_v16 }
 0x1a5   : > { %v1512_v25 = vpack.i.bf16 %v992_v28, %v991_v48  ;;  %v988_v37 = vmul.f32 %v980_v29, %v2301_v13 }
 0x1a7   : > { %1513 = vrot.lane.b32.xlu0 %v1512_v25, %s1719_s12  ;;  %v996_v60 = vadd.f32 %v988_v37, %v2312_v16 }
 0x1a9   : > { %v1517_v26 = vpack.i.bf16 %v996_v60, %v995_v6 }
 0x1ab   : > { %1518 = vrot.lane.b32.xlu1 %v1517_v26, %s1719_s12 }
 0x1c2   : > { %v325_v24 = vpop.xlane.xlu1 %324 }
 0x1c3   : > { %v2350_v35 = vmul.f32 0.0625, %v325_v24 }
 0x1c5   : > { %v395_v33 = vmul.f32 %v2350_v35, %v2350_v35 }
 0x1c6   : > { %v328_v31 = vpop.xlane.xlu0 %327  ;;  %v337_v14 = vpop.xlane.xlu1 %336 }
 0x1c7   : > { %v2352_v55 = vmul.f32 0.0625, %v328_v31  ;;  %v2354_v3 = vmul.f32 0.0625, %v337_v14 }
 0x1c9   : > { %v396_v34 = vmul.f32 %v2352_v55, %v2352_v55  ;;  %v399_v19 = vmul.f32 %v2354_v3, %v2354_v3 }
 0x1ca   : > { %v340_v44 = vpop.xlane.xlu0 %339  ;;  %v505_v45 = vpop.xlane.xlu1 %504 }
 0x1cb   : > { %v2356_v17 = vmul.f32 0.0625, %v505_v45  ;;  %v2364_v58 = vmul.f32 0.0625, %v340_v44 }
 0x1cd   : > { %v599_v36 = vmul.f32 %v2356_v17, %v2356_v17  ;;  %v400_v63 = vmul.f32 %v2364_v58, %v2364_v58 }
 0x1ce   : > { %v508_v46 = vpop.xlane.xlu0 %507  ;;  %v517_v1 = vpop.xlane.xlu1 %516 }
 0x1cf   : > { %v2366_v59 = vmul.f32 0.0625, %v508_v46  ;;  %v2370_v42 = vmul.f32 0.0625, %v517_v1 }
 0x1d1   : > { %v600_v21 = vmul.f32 %v2366_v59, %v2366_v59  ;;  %v603_v10 = vmul.f32 %v2370_v42, %v2370_v42 }
 0x1d2   : > { %v520_v39 = vpop.xlane.xlu0 %519  ;;  %v331_v27 = vpop.xlane.xlu1 %330 }
 0x1d3   : > { %v2372_v12 = vmul.f32 0.0625, %v520_v39  ;;  %v2380_v20 = vmul.f32 0.0625, %v331_v27 }
 0x1d5   : > { %v604_v25 = vmul.f32 %v2372_v12, %v2372_v12  ;;  %v397_v44 = vmul.f32 %v2380_v20, %v2380_v20 }
 0x1d6   : > { %v334_v47 = vpop.xlane.xlu0 %333  ;;  %v343_v32 = vpop.xlane.xlu1 %342 }
 0x1d7   : > { %v2384_v26 = vmul.f32 0.0625, %v334_v47  ;;  %v2388_v1 = vmul.f32 0.0625, %v343_v32 }
 0x1da   : > { %v346_v49 = vpop.xlane.xlu0 %345  ;;  %v2342_v50 = vpop.xlane.xlu1 %510 }
 0x1de   : > { %v2344_v51 = vpop.xlane.xlu0 %513  ;;  %v2346_v52 = vpop.xlane.xlu1 %522 }
 0x1e2   : > { %v2348_v53 = vpop.xlane.xlu0 %525  ;;  %v365_v38 = vpop.xlane.xlu1 %364 }
 0x1e3   : > { %v387_v54 = vmul.f32 0.0625, %v365_v38  ;;  %v2390_v38 = vmul.f32 0.0625, %v346_v49 }
 0x1e5   : > { %v403_v22 = vsub.f32 %v387_v54, %v395_v33  ;;  %v398_v54 = vmul.f32 %v2384_v26, %v2384_v26 }
 0x1e6   : > { %v368_v11 = vpop.xlane.xlu0 %367  ;;  %v377_v56 = vpop.xlane.xlu1 %376 }
 0x1e7   : > { %v388_v0 = vmul.f32 0.0625, %v368_v11  ;;  %v391_v23 = vmul.f32 0.0625, %v377_v56  ;;  %v419_v4 = vadd.f32 1e-05, %v403_v22 }
 0x1e9   : > { %v404_v5 = vsub.f32 %v388_v0, %v396_v34  ;;  %v407_v43 = vsub.f32 %v391_v23, %v399_v19  ;;  %1558 = vrsqrt.f32 %v419_v4  ;;  %v2395_v34 = vmul.f32 0.0625, %v2342_v50 }
 0x1ea   : > { %v380_v57 = vpop.xlane.xlu0 %379  ;;  %v569_v2 = vpop.xlane.xlu1 %568  ;;  %v401_v23 = vmul.f32 %v2388_v1, %v2388_v1  ;;  %v2402_v19 = vmul.f32 0.0625, %v2344_v51  ;;  %v2405_v50 = vmul.f32 0.0625, %v2346_v52 }
 0x1eb   : > { %v591_v30 = vmul.f32 0.0625, %v569_v2  ;;  %v392_v18 = vmul.f32 0.0625, %v380_v57  ;;  %v420_v7 = vadd.f32 1e-05, %v404_v5  ;;  %v423_v37 = vadd.f32 1e-05, %v407_v43 }
 0x1ec   : > { %v402_v57 = vmul.f32 %v2390_v38, %v2390_v38 }
 0x1ed   : > { %v607_v61 = vsub.f32 %v591_v30, %v599_v36  ;;  %v408_v28 = vsub.f32 %v392_v18, %v400_v63  ;;  %1560 = vrsqrt.f32 %v420_v7  ;;  %v601_v18 = vmul.f32 %v2395_v34, %v2395_v34  ;;  %v1590_v63 = vld [vmem:[%s1869_s11] sm:$0xff] }
 0x1ee   : > { %v572_v62 = vpop.xlane.xlu0 %571  ;;  %v581_v9 = vpop.xlane.xlu1 %580  ;;  %v411_v51 = vsub.f32 %v1590_v63, %v2350_v35  ;;  %v615_v7 = vsub.f32 %v1590_v63, %v2356_v17  ;;  %v605_v35 = vmul.f32 %v2405_v50, %v2405_v50 }
 0x1ef   : > { %v592_v8 = vmul.f32 0.0625, %v572_v62  ;;  %v595_v48 = vmul.f32 0.0625, %v581_v9  ;;  %v623_v29 = vadd.f32 1e-05, %v607_v61  ;;  %v424_v39 = vadd.f32 1e-05, %v408_v28 }
 0x1f1   : > { %v608_v15 = vsub.f32 %v592_v8, %v600_v21  ;;  %v611_v6 = vsub.f32 %v595_v48, %v603_v10  ;;  %1562 = vrsqrt.f32 %v623_v29  ;;  %v1591_v21 = vld [vmem:[%s1869_s11 + $0x10] sm:$0xff]  ;;  %v1592_v8 = vld [vmem:[%s1869_s11 + $0x40] sm:$0xff]  ;;  %v602_v48 = vmul.f32 %v2402_v19, %v2402_v19 }
 0x1f2   : > { %v584_v60 = vpop.xlane.xlu0 %583  ;;  %v371_v14 = vpop.xlane.xlu1 %370  ;;  %1564 = vrsqrt.f32 %v423_v37  ;;  %v412_v4 = vsub.f32 %v1591_v21, %v2352_v55  ;;  %v415_v52 = vsub.f32 %v1592_v8, %v2354_v3  ;;  %v2421_v55 = vmul.f32 0.0625, %v2348_v53 }
 0x1f3   : > { %v624_v24 = vadd.f32 1e-05, %v608_v15  ;;  %v596_v31 = vmul.f32 0.0625, %v584_v60  ;;  %v627_v45 = vadd.f32 1e-05, %v611_v6  ;;  %v389_v46 = vmul.f32 0.0625, %v371_v14  ;;  %v1559_v62 = vpop.eup %1558 }
 0x1f4   : > { %v1593_v14 = vld [vmem:[%s1869_s11 + $0x50] sm:$0xff] }
 0x1f5   : > { %v612_v27 = vsub.f32 %v596_v31, %v604_v25  ;;  %v405_v47 = vsub.f32 %v389_v46, %v397_v44  ;;  %1566 = vrsqrt.f32 %v624_v24  ;;  %v416_v44 = vsub.f32 %v1593_v14, %v2364_v58 }
 0x1f6   : > { %v374_v11 = vpop.xlane.xlu0 %373  ;;  %v383_v33 = vpop.xlane.xlu1 %382  ;;  %1568 = vrsqrt.f32 %v627_v45  ;;  %v616_v45 = vsub.f32 %v1591_v21, %v2366_v59  ;;  %v619_v46 = vsub.f32 %v1592_v8, %v2370_v42  ;;  %v620_v53 = vsub.f32 %v1593_v14, %v2372_v12 }
 0x1f7   : > { %v628_v56 = vadd.f32 1e-05, %v612_v27  ;;  %v390_v0 = vmul.f32 0.0625, %v374_v11  ;;  %v393_v32 = vmul.f32 0.0625, %v383_v33  ;;  %1570 = vrsqrt.f32 %v424_v39  ;;  %v1561_v10 = vpop.eup %1560 }
 0x1f8   : > { %v421_v22 = vadd.f32 1e-05, %v405_v47  ;;  %v435_v59 = vmul.f32 %v1559_v62, %v411_v51  ;;  %v1596_v51 = vld [vmem:[%s1869_s11 + $0x60] sm:$0xff] }
 0x1f9   : > { %v406_v49 = vsub.f32 %v390_v0, %v398_v54  ;;  %1572 = vrsqrt.f32 %v628_v56  ;;  %v409_v36 = vsub.f32 %v393_v32, %v401_v23  ;;  %v606_v0 = vmul.f32 %v2421_v55, %v2421_v55 }
 0x1fa   : > { %v386_v2 = vpop.xlane.xlu0 %385  ;;  %v575_v30 = vpop.xlane.xlu1 %574  ;;  %1574 = vrsqrt.f32 %v421_v22  ;;  %v417_v21 = vsub.f32 %v1596_v51, %v2388_v1  ;;  %v449_v8 = vmul.f32 %v2102_v40, %v435_v59 }
 0x1fb   : > { %v394_v5 = vmul.f32 0.0625, %v386_v2  ;;  %v422_v43 = vadd.f32 1e-05, %v406_v49  ;;  %v593_v61 = vmul.f32 0.0625, %v575_v30  ;;  %v1563_v15 = vpop.eup %1562  ;;  %v425_v25 = vadd.f32 1e-05, %v409_v36 }
 0x1fc   : > { %v1565_v6 = vpop.eup %1564  ;;  %v639_v47 = vmul.f32 %v1563_v15, %v615_v7  ;;  %v436_v49 = vmul.f32 %v1561_v10, %v412_v4 }
 0x1fd   : > { %v410_v9 = vsub.f32 %v394_v5, %v402_v57  ;;  %v609_v28 = vsub.f32 %v593_v61, %v601_v18  ;;  %1576 = vrsqrt.f32 %v422_v43  ;;  %v439_v22 = vmul.f32 %v1565_v6, %v415_v52  ;;  %v1594_v5 = vld [vmem:[%s1869_s11 + $0x20] sm:$0xff]  ;;  %v1595_v18 = vld [vmem:[%s1869_s11 + $0x30] sm:$0xff] }
 0x1fe   : > { %v578_v29 = vpop.xlane.xlu0 %577  ;;  %v587_v37 = vpop.xlane.xlu1 %586  ;;  %v650_v36 = vmul.f32 %v2301_v13, %v639_v47  ;;  %v413_v30 = vsub.f32 %v1594_v5, %v2380_v20  ;;  %v414_v43 = vsub.f32 %v1595_v18, %v2384_v26  ;;  %v450_v20 = vmul.f32 %v2102_v40, %v436_v49  ;;  %v1599_v47 = vld [vmem:[%s2574_s2] ss:$0 sm:$0xff] }
 0x1ff   : > { %v594_v3 = vmul.f32 0.0625, %v578_v29  ;;  %v426_v17 = vadd.f32 1e-05, %v410_v9  ;;  %v625_v60 = vadd.f32 1e-05, %v609_v28  ;;  %v597_v24 = vmul.f32 0.0625, %v587_v37  ;;  %v1567_v31 = vpop.eup %1566 }
 0x200   : > { %v1569_v27 = vpop.eup %1568  ;;  %v640_v32 = vmul.f32 %v1567_v31, %v616_v45  ;;  %v1597_v9 = vld [vmem:[%s1869_s11 + $0x70] sm:$0xff]  ;;  %v661_v28 = vadd.f32 %v2312_v16, %v650_v36  ;;  %v453_v1 = vmul.f32 %v2102_v40, %v439_v22  ;;  %v618_v15 = vsub.f32 %v1595_v18, %v2402_v19  ;;  %s1720_s11 = smov [#allocation5]  }
 0x201   : > { %v610_v39 = vsub.f32 %v594_v3, %v602_v48  ;;  %1578 = vrsqrt.f32 %v625_v60  ;;  %v613_v11 = vsub.f32 %v597_v24, %v605_v35  ;;  %v1571_v56 = vpop.eup %1570  ;;  %v643_v12 = vmul.f32 %v1569_v27, %v619_v46  ;;  %s1634_s16 = sshll.u32 %s1720_s11, 4  ;;  %s1635_s16 = int_to_ptr.vmem [resolvable:$false] %s1634_s16 }
 0x202   : > { %v590_v54 = vpop.xlane.xlu0 %589  ;;  %1580 = vrsqrt.f32 %v425_v25  ;;  %v440_v2 = vmul.f32 %v1571_v56, %v416_v44  ;;  %v2435_v62 = vpop.permute.xlu1 %1483  ;;  %v651_v52 = vmul.f32 %v2301_v13, %v640_v32  ;;  %v418_v10 = vsub.f32 %v1597_v9, %v2390_v38  ;;  %s1636_s17 = scalar_lea.vmem %s1635_s16, 2048  ;;  %p1637_p6 = scmp.lt.s32.totalorder %s2520_s27, %s1635_s16 }
 0x203   : > { %v626_v33 = vadd.f32 1e-05, %v610_v39  ;;  %v598_v58 = vmul.f32 0.0625, %v590_v54  ;;  %1582 = vrsqrt.f32 %v426_v17  ;;  %v629_v42 = vadd.f32 1e-05, %v613_v11  ;;  %v1573_v23 = vpop.eup %1572  ;;  %p1638_p13 = scmp.lt.s32.totalorder %s1636_s17, %s1630_s30 }
 0x204   : > { %v1575_v63 = vpop.eup %1574  ;;  %v644_v4 = vmul.f32 %v1573_v23, %v620_v53  ;;  %v654_v26 = vmul.f32 %v2301_v13, %v643_v12  ;;  %v617_v48 = vsub.f32 %v1594_v5, %v2395_v34  ;;  %v454_v29 = vmul.f32 %v2102_v40, %v440_v2 }
 0x205   : > { %1584 = vrsqrt.f32 %v626_v33  ;;  %v614_v57 = vsub.f32 %v598_v58, %v606_v0  ;;  %v621_v35 = vsub.f32 %v1596_v51, %v2405_v50  ;;  %v437_v38 = vmul.f32 %v1575_v63, %v413_v30  ;;  %v1598_v50 = vld [vmem:[%s2575_s3] ss:$0 sm:$0xff]  ;;  %p1639_p2 = por %p1638_p13, %p1637_p6 }
 0x206   : > { %1586 = vrsqrt.f32 %v629_v42  ;;  %v1485_v25 = vunpack.i.l.bf16 %v2435_v62  ;;  %v622_v6 = vsub.f32 %v1597_v9, %v2421_v55  ;;  %v1489_v17 = vpop.permute.xlu0 %1488  ;;  %v463_v34 = vadd.f32 %v2108_v41, %v449_v8 }
 0x207   : > { %v630_v61 = vadd.f32 1e-05, %v614_v57  ;;  %v1577_v7 = vpop.eup %1576  ;;  %v662_v60 = vadd.f32 %v2312_v16, %v651_v52  ;;  %v655_v24 = vmul.f32 %v2301_v13, %v644_v4  ;;  %v464_v14 = vadd.f32 %v1598_v50, %v450_v20  ;;  %p1640_p5 = pnand %p1639_p2, %p1633_p0 }
 0x208   : > { %v438_v31 = vmul.f32 %v1577_v7, %v414_v43  ;;  %v665_v44 = vadd.f32 %v2312_v16, %v654_v26  ;;  %v1486_v55 = vunpack.i.h.bf16 %v2435_v62  ;;  %v1061_v46 = vsel %vm322_vm0, %v463_v34, %v661_v28 }
 0x209   : > { %1588 = vrsqrt.f32 %v630_v61  ;;  %v2452_v3 = vpop.permute.xlu1 %1493  ;;  %v467_v41 = vadd.f32 %v1598_v50, %v453_v1  ;;  %v468_v39 = vadd.f32 %v1598_v50, %v454_v29  ;;  %v1491_v53 = vunpack.i.h.bf16 %v1489_v17 }
 0x20a   : > { %v451_v11 = vmul.f32 %v1599_v47, %v437_v38  ;;  %v1070_v56 = vsel %vm1069_vm1, %v1061_v46, %v1485_v25  ;;  %v1490_v58 = vunpack.i.l.bf16 %v1489_v17  ;;  %v1062_v59 = vsel %vm322_vm0, %v464_v14, %v662_v60 }
 0x20b   : > { %v1579_v37 = vpop.eup %1578  ;;  %v666_v32 = vadd.f32 %v2312_v16, %v655_v24  ;;  %v452_v49 = vmul.f32 %v1599_v47, %v438_v31  ;;  %v1065_v22 = vsel %vm322_vm0, %v467_v41, %v665_v44  ;;  %v1071_v63 = vsel %vm1069_vm1, %v1062_v59, %v1486_v55 }
 0x20c   : > { %v1581_v40 = vpop.eup %1580  ;;  %v641_v19 = vmul.f32 %v1579_v37, %v617_v48  ;;  %v465_v43 = vadd.f32 %v1598_v50, %v451_v11  ;;  %v1074_v26 = vsel %vm1069_vm1, %v1065_v22, %v1490_v58  ;;  %v1496_v34 = vunpack.i.h.bf16 %v2452_v3  ;;  %v1365_v58 = vld [vmem:[%s2576_s4] ss:$0 sm:$0xff] }
 0x20d   : > { %v1583_v45 = vpop.eup %1582  ;;  %v441_v42 = vmul.f32 %v1581_v40, %v417_v21  ;;  %v1499_v12 = vpop.permute.xlu1 %1498  ;;  %v1066_v8 = vsel %vm322_vm0, %v468_v39, %v666_v32  ;;  %v466_v52 = vadd.f32 %v1598_v50, %v452_v49 }
 0x20e   : > { %v652_v54 = vmul.f32 %v2301_v13, %v641_v19  ;;  %v442_v2 = vmul.f32 %v1583_v45, %v418_v10  ;;  %v1075_v38 = vsel %vm1069_vm1, %v1066_v8, %v1491_v53  ;;  %v1501_v41 = vunpack.i.h.bf16 %v1499_v12 }
 0x20f   : > { %v1585_v27 = vpop.eup %1584  ;;  %v455_v9 = vmul.f32 %v1599_v47, %v441_v42  ;;  %v1500_v39 = vunpack.i.l.bf16 %v1499_v12 }
 0x210   : > { %v1587_v0 = vpop.eup %1586  ;;  %v642_v33 = vmul.f32 %v1585_v27, %v618_v15  ;;  %v663_v61 = vadd.f32 %v2312_v16, %v652_v54  ;;  %v456_v7 = vmul.f32 %v1599_v47, %v442_v2 }
 0x211   : > { %v645_v23 = vmul.f32 %v1587_v0, %v621_v35  ;;  %v1504_v57 = vpop.permute.xlu0 %1503  ;;  %v469_v40 = vadd.f32 %v1598_v50, %v455_v9 }
 0x212   : > { %v653_v36 = vmul.f32 %v2301_v13, %v642_v33  ;;  %v1506_v5 = vunpack.i.h.bf16 %v1504_v57  ;;  %v1505_v30 = vunpack.i.l.bf16 %v1504_v57  ;;  %v1063_v29 = vsel %vm322_vm0, %v465_v43, %v663_v61 }
 0x213   : > { %v1589_v18 = vpop.eup %1588  ;;  %v656_v62 = vmul.f32 %v2301_v13, %v645_v23  ;;  %v470_v31 = vadd.f32 %v1598_v50, %v456_v7 }
 0x214   : > { %v646_v51 = vmul.f32 %v1589_v18, %v622_v6  ;;  %v664_v21 = vadd.f32 %v2312_v16, %v653_v36  ;;  %v1079_v4 = vsel %vm1078_vm2, %v1070_v56, %v1505_v30  ;;  %v1080_v20 = vsel %vm1078_vm2, %v1071_v63, %v1506_v5 }
 0x215   : > { %v1509_v10 = vpop.permute.xlu1 %1508  ;;  %v667_v15 = vadd.f32 %v2312_v16, %v656_v62  ;;  %v1087_v35 = vpack.c.bf16 %v1080_v20, %v1079_v4 }
 0x216   : > { %v657_v48 = vmul.f32 %v2301_v13, %v646_v51  ;;  %v1511_v28 = vunpack.i.h.bf16 %v1509_v10  ;;  %v1510_v1 = vunpack.i.l.bf16 %v1509_v10  ;;  %v1064_v25 = vsel %vm322_vm0, %v466_v52, %v664_v21 }
 0x217   : > { %v1495_v13 = vunpack.i.l.bf16 %v2452_v3  ;;  %1397 = vmatprep.mubr.msk.bf16.mxu0 %vm1130_vm3, %v1087_v35  ;;  %v1073_v44 = vsel %vm1069_vm1, %v1064_v25, %v1496_v34  ;;  %v1067_v45 = vsel %vm322_vm0, %v469_v40, %v667_v15 }
 0x218   : > { %v668_v37 = vadd.f32 %v2312_v16, %v657_v48  ;;  %v1083_v6 = vsel %vm1078_vm2, %v1074_v26, %v1510_v1  ;;  %v1084_v17 = vsel %vm1078_vm2, %v1075_v38, %v1511_v28  ;;  %v1076_v54 = vsel %vm1069_vm1, %v1067_v45, %v1500_v39 }
 0x219   : > { %v1514_v60 = vpop.permute.xlu0 %1513  ;;  %v1089_v24 = vpack.c.bf16 %v1084_v17, %v1083_v6  ;;  %v1072_v16 = vsel %vm1069_vm1, %v1063_v29, %v1495_v13 }
 0x21a   : > { %v1516_v19 = vunpack.i.h.bf16 %v1514_v60  ;;  %v1515_v14 = vunpack.i.l.bf16 %v1514_v60  ;;  %v1068_v55 = vsel %vm322_vm0, %v470_v31, %v668_v37 }
 0x21b   : > { %1401 = vmatprep.mubr.msk.bf16.mxu1 %vm1130_vm3, %v1089_v24  ;;  %v1077_v11 = vsel %vm1069_vm1, %v1068_v55, %v1501_v41 }
 0x21c   : > { %v1081_v3 = vsel %vm1078_vm2, %v1072_v16, %v1515_v14  ;;  %v1082_v46 = vsel %vm1078_vm2, %v1073_v44, %v1516_v19 }
 0x21d   : > { %v1088_v50 = vpack.c.bf16 %v1082_v46, %v1081_v3  ;;  %v1519_v27 = vpop.permute.xlu1 %1518 }
 0x21e   : > { %v1521_v53 = vunpack.i.h.bf16 %v1519_v27  ;;  %v1520_v47 = vunpack.i.l.bf16 %v1519_v27 }
 0x21f   : > { %1398 = vmatmul.mubr.msk.bf16.vlgmr.msra.gmra.mrb[0].mxu0 %vm1130_vm3, %v1088_v50 }
 0x220   : > { %v1085_v56 = vsel %vm1078_vm2, %v1076_v54, %v1520_v47  ;;  %v1086_v0 = vsel %vm1078_vm2, %v1077_v11, %v1521_v53 }
 0x221   : > { %v1090_v33 = vpack.c.bf16 %v1086_v0, %v1085_v56 }
 0x223   : > { %1402 = vmatmul.mubr.msk.bf16.vlgmr.msra.gmra.mrb[0].mxu1 %vm1130_vm3, %v1090_v33 }
 0x2f2   : > { %v1399_v59 = vpop.f32.mrb[0].mxu0 }
 0x2f3   : > { %v1186_v32 = vadd.f32 %v1399_v59, %v1365_v58  ;;  %v1177_v42 = vpop.f32.mrb[1].mxu0 }
 0x2f4   : > { %v1178_v23 = vadd.f32 %v1365_v58, %v1177_v42  ;;  %v1400_v49 = vpop.f32.mrb[2].mxu0 }
 0x2f5   : > { %1210 = vst.msk [vmem:[%s293_s15 + $0x10] sm:$0xff] %vm1069_vm1, %v1186_v32  ;;  %v1189_v12 = vadd.f32 %v1400_v49, %v1365_v58  ;;  %v1180_v57 = vpop.f32.mrb[3].mxu0 }
 0x2f6   : > { %1208 = vst.msk [vmem:[%s293_s15] sm:$0xff] %vm1069_vm1, %v1178_v23  ;;  %v1181_v22 = vadd.f32 %v1365_v58, %v1180_v57  ;;  %v1403_v2 = vpop.f32.mrb[0].mxu1 }
 0x2f7   : > { %1211 = vst.msk [vmem:[%s293_s15 + $0x18] sm:$0xff] %vm1069_vm1, %v1189_v12  ;;  %v1202_v36 = vadd.f32 %v1403_v2, %v1365_v58  ;;  %v1193_v5 = vpop.f32.mrb[1].mxu1 }
 0x2f8   : > { %1209 = vst.msk [vmem:[%s293_s15 + $0x8] sm:$0xff] %vm1069_vm1, %v1181_v22  ;;  %v1194_v30 = vadd.f32 %v1365_v58, %v1193_v5  ;;  %v1404_v18 = vpop.f32.mrb[2].mxu1 }
 0x2f9   : > { %1214 = vst.msk [vmem:[%s293_s15 + $0x30] sm:$0xff] %vm1069_vm1, %v1202_v36  ;;  %v1205_v43 = vadd.f32 %v1404_v18, %v1365_v58  ;;  %v1196_v61 = vpop.f32.mrb[3].mxu1 }
 0x2fa   : > { %1212 = vst.msk [vmem:[%s293_s15 + $0x20] sm:$0xff] %vm1069_vm1, %v1194_v30  ;;  %v1197_v62 = vadd.f32 %v1365_v58, %v1196_v61 }
 0x2fb   : > { %1215 = vst.msk [vmem:[%s293_s15 + $0x38] sm:$0xff] %vm1069_vm1, %v1205_v43 }
 0x2fc   : > { %1213 = vst.msk [vmem:[%s293_s15 + $0x28] sm:$0xff] %vm1069_vm1, %v1197_v62 }
 0x2fd   : > { %1643 = shalt.err (!%p1640_p5)
}
 0x2fe   : > { %s1644_s24 = scalar_lea.hbm %s2518_s14, 1024  ;;  %s1648_s13 = scalar_lea.hbm %s2577_s5, 2048 }
 0x2ff   : > { %p1645_p4 = scmp.ne.s32.totalorder %s2518_s14, %s1644_s24  ;;  %p1649_p12 = scmp.lt.u32.totalorder %s2518_s14, %s2577_s5 }
 0x300   : > { %p1650_p1 = scmp.lt.u32.totalorder %s1648_s13, %s1644_s24  ;;  %p1652_p8 = scmp.lt.u32.totalorder %s1644_s24, %s2518_s14 }
 0x301   : > { %p1646_p7 = pnand %p1645_p4, %p2585_p9 }
 0x302   : > { %p1651_p3 = por %p1650_p1, %p1649_p12 }
 0x303   : > { %p1647_p10 = pneg %p1646_p7 }
 0x304   : > { %p1653_p11 = por %p1652_p8, %p1651_p3 }
 0x306   : > { %p1654_p0 = pnand %p1653_p11, %p1647_p10 }
 0x308   : > { %1657 = shalt.err (!%p1654_p0)
}
 0x309   : > { %s1721_s28 = smov 128   ;;  %s1722_s10 = smov 8  }
 0x30a   : > { %1415 = dma.vmem_to_hbm [thread:$0]  (%p2585_p9), %s2520_s27, 1024, %s2518_s14, %s1217_s21, %s1721_s28, %s1721_s28, %s1722_s10  }
 0x30b PF: > { %s1248_s30 = sand.u32 1, %s1692_s18   ;;  %p2586_p6 = scmp.ne.s32.totalorder %s2582_s8, 0 }
 0x30c   : > { %p2587_p13 = scmp.ge.s32.totalorder %s1712_s23, 2  ;;  %s1249_s11 = scalar_lea.sflag [#allocation4], %s1248_s30 }
 0x30e   : > { %p1422_p2 = pnand %p2587_p13, %p2586_p6 }
 0x310   : > { %1687 = dma.done.wait (!%p1422_p2), %s1249_s11, 1024  }
 0x311   : > { %1689 = vsyncadd (!%p1422_p2), %s1249_s11, 4294966272  ;;  %s21_s23 = sadd.s32 1, %s1712_s23   ;;  %s2588_s18 = smov %s1696_s19 }
 0x312   : > { %p18_p5 = scmp.ge.s32.totalorder %s21_s23, 4   ;;  %s2589_s19 = smov %s1700_s20 }
 0x313   : > { %s2590_s20 = smov %s1809_s7  ;;  %s2591_s21 = smov %s1708_s22 }
 0x314   : > { %s2592_s22 = smov %s2594_s26  ;;  %20 = sbr.rel (!%p18_p5) target bundleno = 6 (0x6), region = 91 }
 0x31b   :  { %1254 = vsyncpa [#allocation3], 1 }
 0x31c   :  { %1256 = vsyncpa [#allocation3 + $0x1], 1 }
 0x31d   :  { %1257 = vsyncpa [#allocation4], 1 }
 0x31e   :  { %1259 = vsyncpa [#allocation4 + $0x1], 1 }

</bundles_post_ra>
